<compile_context>
chip_gen: v7x
topology: tpu7x:2x2x1
jax: 0.10.0
libtpu: 0.0.40
codegen_flags: <defaults>
</compile_context>

<pallas_src>
from collections import namedtuple

import jax
import jax.numpy as jnp
from jax import lax
from jax.experimental import pallas as pl
from jax.experimental.pallas import tpu as pltpu


# ----------------------------------------------------------------------------
# Fused kernel: conv1(im2col, K=27) + BN + ReLU  ->  VMEM band  ->
#               conv2(kx-packed, K=192) + BN + ReLU
# ----------------------------------------------------------------------------
def _fused_vgg_block_kernel(p_ref, w1_ref, b1_ref, w2_ref, b2_ref, o_ref,
                            h1_scr, acc_scr):
    # p_ref  : (1, 1, (TH+2)*W, 9*Cin) bf16  conv1 im2col patches, band + halo
    # w1_ref : (9*Cin, Cmid)           bf16  conv1 weights (BN scale folded in)
    # b1_ref : (1, Cmid)               f32   folded BN bias for conv1
    # w2_ref : (3, 3*Cmid, Cout)       bf16  conv2 weights, kx packed into K
    # b2_ref : (1, Cout)               f32   folded BN bias for conv2
    # o_ref  : (1, TH, W, Cout)        f32   relu1_2 output band
    # h1_scr : (TH+2, W+2, Cmid)       bf16  zero-padded relu1_1 band (VMEM)
    # acc_scr: (TH*W, Cout)            f32   conv2 accumulator (VMEM)
    TH, W, Cout = o_ref.shape[1], o_ref.shape[2], o_ref.shape[3]
    Cmid = h1_scr.shape[2]
    t = pl.program_id(1)
    n_tiles = pl.num_programs(1)

    # ---- conv1 + BN + ReLU: a single K-packed MXU matmul (K = 9*Cin) ----
    h1 = jnp.dot(p_ref[0, 0], w1_ref[...], preferred_element_type=jnp.float32)
    h1 = jnp.maximum(h1 + b1_ref[0, :], 0.0)                  # f32 epilogue
    h1 = h1.astype(h1_scr.dtype).reshape(TH + 2, W, Cmid)

    # ---- stage relu1_1 band in VMEM with zero spatial padding ----
    zcol = jnp.zeros((TH + 2, 1, Cmid), h1_scr.dtype)
    h1_scr[:, 0:1, :] = zcol                    # left zero-pad column
    h1_scr[:, W + 1:W + 2, :] = zcol            # right zero-pad column
    h1_scr[:, 1:W + 1, :] = h1                  # interior (TH+2 rows)

    zrow = jnp.zeros((1, W + 2, Cmid), h1_scr.dtype)

    @pl.when(t == 0)                            # top image border: halo row = 0
    def _():
        h1_scr[0:1, :, :] = zrow

    @pl.when(t == n_tiles - 1)                  # bottom image border
    def _():
        h1_scr[TH + 1:TH + 2, :, :] = zrow

    # ---- conv2 + BN + ReLU: 3 matmuls with K = 3*Cmid (kx packed into K) ----
    for ky in range(3):                         # static, unrolled at trace time
        rows = h1_scr[ky:ky + TH, :, :]                        # (TH, W+2, Cmid)
        patch = jnp.concatenate(
            [rows[:, 0:W, :], rows[:, 1:W + 1, :], rows[:, 2:W + 2, :]],
            axis=-1).reshape(TH * W, 3 * Cmid)                 # (TH*W, 192)
        contrib = jnp.dot(patch, w2_ref[ky],
                          preferred_element_type=jnp.float32)
        if ky == 0:
            acc_scr[...] = contrib
        else:
            acc_scr[...] += contrib

    y = jnp.maximum(acc_scr[...] + b2_ref[0, :], 0.0)          # f32 epilogue
    o_ref[...] = y.reshape(1, TH, W, Cout).astype(o_ref.dtype)


# ----------------------------------------------------------------------------
# Wrapper helpers
# ----------------------------------------------------------------------------
def _fold_bn(conv_b, gamma, beta, mean, var, eps=1e-5):
    scale = gamma / jnp.sqrt(var + eps)
    bias = (conv_b - mean) * scale + beta
    return scale, bias


def _im2col_3x3(x_nhwc):
    """(N,H,W,C) -> (N,H,W,9*C) with tap order (ky, kx, c); SAME zero padding."""
    N, H, W, C = x_nhwc.shape
    xpad = jnp.pad(x_nhwc, ((0, 0), (1, 1), (1, 1), (0, 0)))
    taps = []
    for ky in range(3):
        for kx in range(3):
            taps.append(xpad[:, ky:ky + H, kx:kx + W, :])
    return jnp.concatenate(taps, axis=-1)


def _pick_row_tile(H, max_rows=32):
    """Largest divisor of H that is <= max_rows and gives >= 2 row tiles."""
    best = H
    for d in range(1, H + 1):
        if H % d == 0 and d <= max_rows and H // d >= 2:
            best = d
    return best


def _band_rows(patches, TH):
    """(N,H,W,K) conv1 patches -> (N, nT, (TH+2)*W, K) overlapping row bands.

    Band t covers relu1_1 rows [t*TH - 1, t*TH + TH] (1-row halo each side);
    out-of-image halo rows are zero patch rows and get zeroed after conv1
    in-kernel (only needed for the first/last band).
    """
    N, H, W, K = patches.shape
    nT = H // TH
    p_hpad = jnp.pad(patches, ((0, 0), (1, 1), (0, 0), (0, 0)))
    idx = jnp.arange(nT)[:, None] * TH + jnp.arange(TH + 2)[None, :]
    bands = p_hpad[:, idx]                              # (N, nT, TH+2, W, K)
    return bands.reshape(N, nT, (TH + 2) * W, K)


VggOutputs = namedtuple("VggOutputs", ["relu1_2"])


def vgg16_fix_forward(x_nchw, params, *, max_tile_rows=32):
    """Equivalent of Vgg16_fix.forward: slice0 -> slice1, returns relu1_2 (NCHW)."""
    x = jnp.transpose(x_nchw, (0, 2, 3, 1))             # NCHW -> NHWC
    N, H, W, Cin = x.shape
    Cmid = params["w1"].shape[-1]
    Cout = params["w2"].shape[-1]

    # Fold inference BN into conv weights (scale) and per-channel bias.
    s1, b1 = _fold_bn(params["b1"], params["g1"], params["beta1"],
                      params["m1"], params["v1"])
    s2, b2 = _fold_bn(params["b2"], params["g2"], params["beta2"],
                      params["m2"], params["v2"])
    w1 = (params["w1"] * s1).reshape(9 * Cin, Cmid).astype(jnp.bfloat16)
    w2 = (params["w2"] * s2).reshape(3, 3 * Cmid, Cout).astype(jnp.bfloat16)
    b1 = b1.reshape(1, Cmid).astype(jnp.float32)
    b2 = b2.reshape(1, Cout).astype(jnp.float32)

    TH = _pick_row_tile(H, max_tile_rows)
    nT = H // TH

    patches = _im2col_3x3(x)                                   # (N,H,W,9*Cin)
    bands = _band_rows(patches, TH).astype(jnp.bfloat16)       # (N,nT,(TH+2)W,27)

    out = pl.pallas_call(
        _fused_vgg_block_kernel,
        out_shape=jax.ShapeDtypeStruct((N, H, W, Cout), jnp.float32),
        grid=(N, nT),
        in_specs=[
            pl.BlockSpec((1, 1, (TH + 2) * W, 9 * Cin), lambda n, t: (n, t, 0, 0)),
            pl.BlockSpec((9 * Cin, Cmid), lambda n, t: (0, 0)),
            pl.BlockSpec((1, Cmid), lambda n, t: (0, 0)),
            pl.BlockSpec((3, 3 * Cmid, Cout), lambda n, t: (0, 0, 0)),
            pl.BlockSpec((1, Cout), lambda n, t: (0, 0)),
        ],
        out_specs=pl.BlockSpec((1, TH, W, Cout), lambda n, t: (n, t, 0, 0)),
        scratch_shapes=[
            pltpu.VMEM((TH + 2, W + 2, Cmid), jnp.bfloat16),   # relu1_1 band
            pltpu.VMEM((TH * W, Cout), jnp.float32),           # conv2 accumulator
        ],
        compiler_params=pltpu.CompilerParams(
            dimension_semantics=("parallel", "parallel"),
            vmem_limit_bytes=64 * 1024 * 1024),
    )(bands, w1, b1, w2, b2)

    h = jnp.transpose(out, (0, 3, 1, 2))                 # NHWC -> NCHW
    return VggOutputs(relu1_2=h)


# ----------------------------------------------------------------------------
# Synthetic deterministic parameters (shapes of vgg16_bn.features[0:6])
# ----------------------------------------------------------------------------
def make_params(key, cin=3, cmid=64, cout=64):
    ks = jax.random.split(key, 12)
    p = {}
    # slice0: Conv2d(cin, cmid, 3, pad=1) + BatchNorm2d(cmid) + ReLU
    p["w1"] = 0.1 * jax.random.normal(ks[0], (3, 3, cin, cmid), jnp.float32)
    p["b1"] = 0.1 * jax.random.normal(ks[1], (cmid,), jnp.float32)
    p["g1"] = 1.0 + 0.1 * jax.random.normal(ks[2], (cmid,), jnp.float32)
    p["beta1"] = 0.1 * jax.random.normal(ks[3], (cmid,), jnp.float32)
    p["m1"] = 0.1 * jax.random.normal(ks[4], (cmid,), jnp.float32)
    p["v1"] = jax.random.uniform(ks[5], (cmid,), jnp.float32, 0.5, 1.5)
    # slice1: Conv2d(cmid, cout, 3, pad=1) + BatchNorm2d(cout) + ReLU
    p["w2"] = 0.1 * jax.random.normal(ks[6], (3, 3, cmid, cout), jnp.float32)
    p["b2"] = 0.1 * jax.random.normal(ks[7], (cout,), jnp.float32)
    p["g2"] = 1.0 + 0.1 * jax.random.normal(ks[8], (cout,), jnp.float32)
    p["beta2"] = 0.1 * jax.random.normal(ks[9], (cout,), jnp.float32)
    p["m2"] = 0.1 * jax.random.normal(ks[10], (cout,), jnp.float32)
    p["v2"] = jax.random.uniform(ks[11], (cout,), jnp.float32, 0.5, 1.5)
    return p


def _reference_forward(x_nchw, params):
    """Pure-JAX f32 reference (lax.conv) for a numerical sanity check."""
    x = jnp.transpose(x_nchw, (0, 2, 3, 1))
    dn = ("NHWC", "HWIO", "NHWC")

    def block(x, w, b, g, beta, m, v):
        y = lax.conv_general_dilated(x, w, (1, 1), "SAME",
                                     dimension_numbers=dn)
        s, bb = _fold_bn(b, g, beta, m, v)
        return jnp.maximum(y * s + bb, 0.0)

    h = block(x, params["w1"], params["b1"], params["g1"], params["beta1"],
              params["m1"], params["v1"])
    h = block(h, params["w2"], params["b2"], params["g2"], params["beta2"],
              params["m2"], params["v2"])
    return jnp.transpose(h, (0, 3, 1, 2))


if __name__ == "__main__":
    key = jax.random.PRNGKey(0)
    kx, kp = jax.random.split(key)

    # Small shapes consistent with the module: NCHW, Cin=3 (vgg16 input).
    x = jax.random.normal(kx, (2, 3, 16, 16), jnp.float32)
    params = make_params(kp, cin=3, cmid=64, cout=64)

    feats = vgg16_fix_forward(x, params)
    out = jax.block_until_ready(feats.relu1_2)

    ref = jax.block_until_ready(_reference_forward(x, params))
    assert out.shape == (2, 64, 16, 16)
    # bf16 MXU operands (f32 accumulate) vs f32 reference -> loose tolerance.
    err = float(jnp.max(jnp.abs(out - ref)))
    assert jnp.allclose(out, ref, rtol=5e-2, atol=5e-2), err

    print("KERNEL_OK")
</pallas_src>

<mosaic_0001>
module attributes {stable_mosaic.version = 11 : i64} {
  func.func @_fused_vgg_block_kernel(%arg0: i32, %arg1: i32, %arg2: memref<1x1x160x27xbf16, #tpu.memory_space<vmem>>, %arg3: memref<27x64xbf16, #tpu.memory_space<vmem>>, %arg4: memref<1x64xf32, #tpu.memory_space<vmem>>, %arg5: memref<3x192x64xbf16, #tpu.memory_space<vmem>>, %arg6: memref<1x64xf32, #tpu.memory_space<vmem>>, %arg7: memref<1x8x16x64xf32, #tpu.memory_space<vmem>>, %arg8: memref<10x18x64xbf16, #tpu.memory_space<vmem>>, %arg9: memref<128x64xf32, #tpu.memory_space<vmem>>) attributes {dimension_semantics = [#tpu.dimension_semantics<parallel>, #tpu.dimension_semantics<parallel>], iteration_bounds = array<i64: 2, 2>, scalar_prefetch = 0 : i64, scratch_operands = 2 : i64, tpu.core_type = #tpu.core_type<tc>, window_params = [{transform_indices = @transform_0, window_bounds = array<i64: 1, 1, 160, 27>}, {pipeline_mode = #tpu.pipeline_mode<synchronous>, transform_indices = @transform_1, window_bounds = array<i64: 27, 64>}, {pipeline_mode = #tpu.pipeline_mode<synchronous>, transform_indices = @transform_2, window_bounds = array<i64: 1, 64>}, {pipeline_mode = #tpu.pipeline_mode<synchronous>, transform_indices = @transform_3, window_bounds = array<i64: 3, 192, 64>}, {pipeline_mode = #tpu.pipeline_mode<synchronous>, transform_indices = @transform_4, window_bounds = array<i64: 1, 64>}, {transform_indices = @transform_5, window_bounds = array<i64: 1, 8, 16, 64>}]} {
    %c0 = arith.constant 0 : index
    %c0_0 = arith.constant 0 : index
    %c0_1 = arith.constant 0 : index
    %c0_2 = arith.constant 0 : index
    %0 = vector.load %arg2[%c0, %c0_0, %c0_1, %c0_2] : memref<1x1x160x27xbf16, #tpu.memory_space<vmem>>, vector<1x1x160x27xbf16>
    %1 = vector.shape_cast %0 : vector<1x1x160x27xbf16> to vector<160x27xbf16>
    %c0_3 = arith.constant 0 : index
    %c0_4 = arith.constant 0 : index
    %2 = vector.load %arg3[%c0_3, %c0_4] : memref<27x64xbf16, #tpu.memory_space<vmem>>, vector<27x64xbf16>
    %cst = arith.constant dense<0.000000e+00> : vector<160x64xf32>
    %3 = tpu.matmul %1, %2, %cst {dimension_numbers = #tpu.dot_dimension_numbers<[1], [0], [0], [1], [0, 0, 1, 1], [], []>} : vector<160x27xbf16>, vector<27x64xbf16>, vector<160x64xf32> -> vector<160x64xf32>
    %c0_5 = arith.constant 0 : index
    %c0_6 = arith.constant 0 : index
    %4 = vector.load %arg4[%c0_5, %c0_6] : memref<1x64xf32, #tpu.memory_space<vmem>>, vector<1x64xf32>
    %5 = vector.shape_cast %4 : vector<1x64xf32> to vector<64xf32>
    %6 = vector.shape_cast %5 : vector<64xf32> to vector<1x64xf32>
    %7 = vector.broadcast %6 : vector<1x64xf32> to vector<160x64xf32>
    %8 = arith.addf %3, %7 : vector<160x64xf32>
    %cst_7 = arith.constant 0.000000e+00 : f32
    %9 = vector.broadcast %cst_7 : f32 to vector<160x64xf32>
    %10 = arith.maximumf %8, %9 : vector<160x64xf32>
    %11 = arith.truncf %10 : vector<160x64xf32> to vector<160x64xbf16>
    %12 = vector.shape_cast %11 : vector<160x64xbf16> to vector<10x16x64xbf16>
    %cst_8 = arith.constant 0.000000e+00 : bf16
    %13 = vector.broadcast %cst_8 : bf16 to vector<10x1x64xbf16>
    %c0_9 = arith.constant 0 : index
    %c0_10 = arith.constant 0 : index
    %c0_11 = arith.constant 0 : index
    %14 = vector.load %arg8[%c0_9, %c0_10, %c0_11] : memref<10x18x64xbf16, #tpu.memory_space<vmem>>, vector<10x1x64xbf16>
    tpu.vector_store %arg8[%c0_9, %c0_10, %c0_11], %13 {strides = array<i32>} : memref<10x18x64xbf16, #tpu.memory_space<vmem>>, vector<10x1x64xbf16>,
    %c0_12 = arith.constant 0 : index
    %c17 = arith.constant 17 : index
    %c0_13 = arith.constant 0 : index
    %15 = vector.load %arg8[%c0_12, %c17, %c0_13] : memref<10x18x64xbf16, #tpu.memory_space<vmem>>, vector<10x1x64xbf16>
    tpu.vector_store %arg8[%c0_12, %c17, %c0_13], %13 {strides = array<i32>} : memref<10x18x64xbf16, #tpu.memory_space<vmem>>, vector<10x1x64xbf16>,
    %c0_14 = arith.constant 0 : index
    %c1 = arith.constant 1 : index
    %c0_15 = arith.constant 0 : index
    %16 = vector.load %arg8[%c0_14, %c1, %c0_15] : memref<10x18x64xbf16, #tpu.memory_space<vmem>>, vector<10x16x64xbf16>
    tpu.vector_store %arg8[%c0_14, %c1, %c0_15], %12 {strides = array<i32>} : memref<10x18x64xbf16, #tpu.memory_space<vmem>>, vector<10x16x64xbf16>,
    %cst_16 = arith.constant 0.000000e+00 : bf16
    %17 = vector.broadcast %cst_16 : bf16 to vector<1x18x64xbf16>
    %c0_i32 = arith.constant 0 : i32
    %18 = arith.cmpi eq, %arg1, %c0_i32 : i32
    %19 = arith.extui %18 : i1 to i32
    %c0_i32_17 = arith.constant 0 : i32
    %20 = arith.cmpi ne, %19, %c0_i32_17 : i32
    scf.if %20 {
      %c0_58 = arith.constant 0 : index
      %c0_59 = arith.constant 0 : index
      %c0_60 = arith.constant 0 : index
      %68 = vector.load %arg8[%c0_58, %c0_59, %c0_60] : memref<10x18x64xbf16, #tpu.memory_space<vmem>>, vector<1x18x64xbf16>
      tpu.vector_store %arg8[%c0_58, %c0_59, %c0_60], %17 {strides = array<i32>} : memref<10x18x64xbf16, #tpu.memory_space<vmem>>, vector<1x18x64xbf16>,
    } else {
    }
    %c1_i32 = arith.constant 1 : i32
    %21 = arith.cmpi eq, %arg1, %c1_i32 : i32
    %22 = arith.extui %21 : i1 to i32
    %c0_i32_18 = arith.constant 0 : i32
    %23 = arith.cmpi ne, %22, %c0_i32_18 : i32
    scf.if %23 {
      %c9 = arith.constant 9 : index
      %c0_58 = arith.constant 0 : index
      %c0_59 = arith.constant 0 : index
      %68 = vector.load %arg8[%c9, %c0_58, %c0_59] : memref<10x18x64xbf16, #tpu.memory_space<vmem>>, vector<1x18x64xbf16>
      tpu.vector_store %arg8[%c9, %c0_58, %c0_59], %17 {strides = array<i32>} : memref<10x18x64xbf16, #tpu.memory_space<vmem>>, vector<1x18x64xbf16>,
    } else {
    }
    %c0_19 = arith.constant 0 : index
    %c0_20 = arith.constant 0 : index
    %c0_21 = arith.constant 0 : index
    %24 = vector.load %arg8[%c0_19, %c0_20, %c0_21] : memref<10x18x64xbf16, #tpu.memory_space<vmem>>, vector<8x18x64xbf16>
    %25 = vector.extract_strided_slice %24 {offsets = [0, 0, 0], sizes = [8, 16, 64], strides = [1, 1, 1]} : vector<8x18x64xbf16> to vector<8x16x64xbf16>
    %26 = vector.extract_strided_slice %24 {offsets = [0, 1, 0], sizes = [8, 16, 64], strides = [1, 1, 1]} : vector<8x18x64xbf16> to vector<8x16x64xbf16>
    %27 = vector.extract_strided_slice %24 {offsets = [0, 2, 0], sizes = [8, 16, 64], strides = [1, 1, 1]} : vector<8x18x64xbf16> to vector<8x16x64xbf16>
    %28 = tpu.concatenate %25, %26, %27 in 2 : vector<8x16x64xbf16>, vector<8x16x64xbf16>, vector<8x16x64xbf16> -> vector<8x16x192xbf16>
    %29 = vector.shape_cast %28 : vector<8x16x192xbf16> to vector<128x192xbf16>
    %c0_22 = arith.constant 0 : index
    %c0_23 = arith.constant 0 : index
    %c0_24 = arith.constant 0 : index
    %30 = vector.load %arg5[%c0_22, %c0_23, %c0_24] : memref<3x192x64xbf16, #tpu.memory_space<vmem>>, vector<1x192x64xbf16>
    %31 = vector.shape_cast %30 : vector<1x192x64xbf16> to vector<192x64xbf16>
    %cst_25 = arith.constant dense<0.000000e+00> : vector<128x64xf32>
    %32 = tpu.matmul %29, %31, %cst_25 {dimension_numbers = #tpu.dot_dimension_numbers<[1], [0], [0], [1], [0, 0, 1, 1], [], []>} : vector<128x192xbf16>, vector<192x64xbf16>, vector<128x64xf32> -> vector<128x64xf32>
    %c0_26 = arith.constant 0 : index
    %c0_27 = arith.constant 0 : index
    %33 = vector.load %arg9[%c0_26, %c0_27] : memref<128x64xf32, #tpu.memory_space<vmem>>, vector<128x64xf32>
    tpu.vector_store %arg9[%c0_26, %c0_27], %32 {strides = array<i32>} : memref<128x64xf32, #tpu.memory_space<vmem>>, vector<128x64xf32>,
    %c1_28 = arith.constant 1 : index
    %c0_29 = arith.constant 0 : index
    %c0_30 = arith.constant 0 : index
    %34 = vector.load %arg8[%c1_28, %c0_29, %c0_30] : memref<10x18x64xbf16, #tpu.memory_space<vmem>>, vector<8x18x64xbf16>
    %35 = vector.extract_strided_slice %34 {offsets = [0, 0, 0], sizes = [8, 16, 64], strides = [1, 1, 1]} : vector<8x18x64xbf16> to vector<8x16x64xbf16>
    %36 = vector.extract_strided_slice %34 {offsets = [0, 1, 0], sizes = [8, 16, 64], strides = [1, 1, 1]} : vector<8x18x64xbf16> to vector<8x16x64xbf16>
    %37 = vector.extract_strided_slice %34 {offsets = [0, 2, 0], sizes = [8, 16, 64], strides = [1, 1, 1]} : vector<8x18x64xbf16> to vector<8x16x64xbf16>
    %38 = tpu.concatenate %35, %36, %37 in 2 : vector<8x16x64xbf16>, vector<8x16x64xbf16>, vector<8x16x64xbf16> -> vector<8x16x192xbf16>
    %39 = vector.shape_cast %38 : vector<8x16x192xbf16> to vector<128x192xbf16>
    %c1_31 = arith.constant 1 : index
    %c0_32 = arith.constant 0 : index
    %c0_33 = arith.constant 0 : index
    %40 = vector.load %arg5[%c1_31, %c0_32, %c0_33] : memref<3x192x64xbf16, #tpu.memory_space<vmem>>, vector<1x192x64xbf16>
    %41 = vector.shape_cast %40 : vector<1x192x64xbf16> to vector<192x64xbf16>
    %cst_34 = arith.constant dense<0.000000e+00> : vector<128x64xf32>
    %42 = tpu.matmul %39, %41, %cst_34 {dimension_numbers = #tpu.dot_dimension_numbers<[1], [0], [0], [1], [0, 0, 1, 1], [], []>} : vector<128x192xbf16>, vector<192x64xbf16>, vector<128x64xf32> -> vector<128x64xf32>
    %c0_35 = arith.constant 0 : index
    %c0_36 = arith.constant 0 : index
    %43 = vector.load %arg9[%c0_35, %c0_36] : memref<128x64xf32, #tpu.memory_space<vmem>>, vector<128x64xf32>
    %44 = arith.addf %43, %42 : vector<128x64xf32>
    %c0_37 = arith.constant 0 : index
    %c0_38 = arith.constant 0 : index
    %45 = vector.load %arg9[%c0_37, %c0_38] : memref<128x64xf32, #tpu.memory_space<vmem>>, vector<128x64xf32>
    tpu.vector_store %arg9[%c0_37, %c0_38], %44 {strides = array<i32>} : memref<128x64xf32, #tpu.memory_space<vmem>>, vector<128x64xf32>,
    %c2 = arith.constant 2 : index
    %c0_39 = arith.constant 0 : index
    %c0_40 = arith.constant 0 : index
    %46 = vector.load %arg8[%c2, %c0_39, %c0_40] : memref<10x18x64xbf16, #tpu.memory_space<vmem>>, vector<8x18x64xbf16>
    %47 = vector.extract_strided_slice %46 {offsets = [0, 0, 0], sizes = [8, 16, 64], strides = [1, 1, 1]} : vector<8x18x64xbf16> to vector<8x16x64xbf16>
    %48 = vector.extract_strided_slice %46 {offsets = [0, 1, 0], sizes = [8, 16, 64], strides = [1, 1, 1]} : vector<8x18x64xbf16> to vector<8x16x64xbf16>
    %49 = vector.extract_strided_slice %46 {offsets = [0, 2, 0], sizes = [8, 16, 64], strides = [1, 1, 1]} : vector<8x18x64xbf16> to vector<8x16x64xbf16>
    %50 = tpu.concatenate %47, %48, %49 in 2 : vector<8x16x64xbf16>, vector<8x16x64xbf16>, vector<8x16x64xbf16> -> vector<8x16x192xbf16>
    %51 = vector.shape_cast %50 : vector<8x16x192xbf16> to vector<128x192xbf16>
    %c2_41 = arith.constant 2 : index
    %c0_42 = arith.constant 0 : index
    %c0_43 = arith.constant 0 : index
    %52 = vector.load %arg5[%c2_41, %c0_42, %c0_43] : memref<3x192x64xbf16, #tpu.memory_space<vmem>>, vector<1x192x64xbf16>
    %53 = vector.shape_cast %52 : vector<1x192x64xbf16> to vector<192x64xbf16>
    %cst_44 = arith.constant dense<0.000000e+00> : vector<128x64xf32>
    %54 = tpu.matmul %51, %53, %cst_44 {dimension_numbers = #tpu.dot_dimension_numbers<[1], [0], [0], [1], [0, 0, 1, 1], [], []>} : vector<128x192xbf16>, vector<192x64xbf16>, vector<128x64xf32> -> vector<128x64xf32>
    %c0_45 = arith.constant 0 : index
    %c0_46 = arith.constant 0 : index
    %55 = vector.load %arg9[%c0_45, %c0_46] : memref<128x64xf32, #tpu.memory_space<vmem>>, vector<128x64xf32>
    %56 = arith.addf %55, %54 : vector<128x64xf32>
    %c0_47 = arith.constant 0 : index
    %c0_48 = arith.constant 0 : index
    %57 = vector.load %arg9[%c0_47, %c0_48] : memref<128x64xf32, #tpu.memory_space<vmem>>, vector<128x64xf32>
    tpu.vector_store %arg9[%c0_47, %c0_48], %56 {strides = array<i32>} : memref<128x64xf32, #tpu.memory_space<vmem>>, vector<128x64xf32>,
    %c0_49 = arith.constant 0 : index
    %c0_50 = arith.constant 0 : index
    %58 = vector.load %arg9[%c0_49, %c0_50] : memref<128x64xf32, #tpu.memory_space<vmem>>, vector<128x64xf32>
    %c0_51 = arith.constant 0 : index
    %c0_52 = arith.constant 0 : index
    %59 = vector.load %arg6[%c0_51, %c0_52] : memref<1x64xf32, #tpu.memory_space<vmem>>, vector<1x64xf32>
    %60 = vector.shape_cast %59 : vector<1x64xf32> to vector<64xf32>
    %61 = vector.shape_cast %60 : vector<64xf32> to vector<1x64xf32>
    %62 = vector.broadcast %61 : vector<1x64xf32> to vector<128x64xf32>
    %63 = arith.addf %58, %62 : vector<128x64xf32>
    %cst_53 = arith.constant 0.000000e+00 : f32
    %64 = vector.broadcast %cst_53 : f32 to vector<128x64xf32>
    %65 = arith.maximumf %63, %64 : vector<128x64xf32>
    %66 = vector.shape_cast %65 : vector<128x64xf32> to vector<1x8x16x64xf32>
    %c0_54 = arith.constant 0 : index
    %c0_55 = arith.constant 0 : index
    %c0_56 = arith.constant 0 : index
    %c0_57 = arith.constant 0 : index
    %67 = vector.load %arg7[%c0_54, %c0_55, %c0_56, %c0_57] : memref<1x8x16x64xf32, #tpu.memory_space<vmem>>, vector<1x8x16x64xf32>
    tpu.vector_store %arg7[%c0_54, %c0_55, %c0_56, %c0_57], %66 {strides = array<i32>} : memref<1x8x16x64xf32, #tpu.memory_space<vmem>>, vector<1x8x16x64xf32>,
    return
  }
  func.func @transform_0(%arg0: i32, %arg1: i32) -> (i32, i32, i32, i32) {
    %c0_i32 = arith.constant 0 : i32
    %c0_i32_0 = arith.constant 0 : i32
    %c0_i32_1 = arith.constant 0 : i32
    return %arg0, %arg1, %c0_i32, %c0_i32_0 : i32, i32, i32, i32
  }
  func.func @transform_1(%arg0: i32, %arg1: i32) -> (i32, i32) {
    %c0_i32 = arith.constant 0 : i32
    %c0_i32_0 = arith.constant 0 : i32
    %c0_i32_1 = arith.constant 0 : i32
    return %c0_i32, %c0_i32_0 : i32, i32
  }
  func.func @transform_2(%arg0: i32, %arg1: i32) -> (i32, i32) {
    %c0_i32 = arith.constant 0 : i32
    %c0_i32_0 = arith.constant 0 : i32
    %c0_i32_1 = arith.constant 0 : i32
    return %c0_i32, %c0_i32_0 : i32, i32
  }
  func.func @transform_3(%arg0: i32, %arg1: i32) -> (i32, i32, i32) {
    %c0_i32 = arith.constant 0 : i32
    %c0_i32_0 = arith.constant 0 : i32
    %c0_i32_1 = arith.constant 0 : i32
    %c0_i32_2 = arith.constant 0 : i32
    return %c0_i32, %c0_i32_0, %c0_i32_1 : i32, i32, i32
  }
  func.func @transform_4(%arg0: i32, %arg1: i32) -> (i32, i32) {
    %c0_i32 = arith.constant 0 : i32
    %c0_i32_0 = arith.constant 0 : i32
    %c0_i32_1 = arith.constant 0 : i32
    return %c0_i32, %c0_i32_0 : i32, i32
  }
  func.func @transform_5(%arg0: i32, %arg1: i32) -> (i32, i32, i32, i32) {
    %c0_i32 = arith.constant 0 : i32
    %c0_i32_0 = arith.constant 0 : i32
    %c0_i32_1 = arith.constant 0 : i32
    return %arg0, %arg1, %c0_i32, %c0_i32_0 : i32, i32, i32, i32
  }
}

</mosaic_0001>

<bundles_post_ra>
// kernel: tpu_custom_call.1
= control target key start
LH: loop header
LB: loop body
LE: loop exit
PB: predicated region body
PF: predicated region fallthrough
CT: control target
= control target key end

     0   :  { %s4590_s0 = inlined_call_operand.hbm [shape: bf16[2,2,160,27], index: 0, kind: input, shape index: {}]   ;;  %s4591_s1 = inlined_call_operand.hbm [shape: bf16[27,64], index: 1, kind: input, shape index: {}]   ;;  %s4592_s2 = inlined_call_operand.hbm [shape: f32[1,64], index: 2, kind: input, shape index: {}]   ;;  %s4593_s3 = inlined_call_operand.hbm [shape: bf16[3,192,64], index: 3, kind: input, shape index: {}]   ;;  %s4594_s4 = inlined_call_operand.hbm [shape: f32[1,64], index: 4, kind: input, shape index: {}]   ;;  %s4595_s5 = inlined_call_operand.hbm [shape: f32[2,16,16,64], index: 5, kind: output, shape index: {}]  }
   0x1   :  { %4605 = sst [smem:[#allocation21_spill]] %s4591_s1 }
   0x2   :  { %4606 = sst [smem:[#allocation22_spill]] %s4592_s2 }
   0x3   :  { %4607 = sst [smem:[#allocation23_spill]] %s4593_s3 }
   0x4   :  { %4608 = sst [smem:[#allocation24_spill]] %s4595_s5 }
   0x5   :  { %10 = vsyncpa [#allocation5], 0 }
   0x6   :  { %12 = vsyncpa [#allocation5 + $0x1], 0 }
   0x7   :  { %13 = vsyncpa [#allocation8], 0 }
   0x8   :  { %14 = vsyncpa [#allocation11], 0 }
   0x9   :  { %15 = vsyncpa [#allocation6], 0 }
   0xa   :  { %17 = vsyncpa [#allocation6 + $0x1], 0  ;;  %s3517_s18 = smov 0   ;;  %s3519_s19 = smov 0  }
   0xb   :  { %s3521_s20 = smov 0   ;;  %s3523_s21 = smov 0  }
   0xc   :  { %s3525_s22 = smov 0   ;;  %s3527_s23 = smov 0  }
   0xd   :  { %s3529_s24 = smov 0   ;;  %s3531_s25 = smov 0  }
   0xe LB: > { %4609 = sst [smem:[#allocation18_spill]] %s3442_s18  ;;  %s2727_s26 = sadd.s32 4294967295, %s3470_s25   ;;  %s3470_s25 = sphi %s3531_s25, %s23_s25   ;;  %s3466_s24 = sphi %s3529_s24, %s4650_s24   ;;  %s3462_s23 = sphi %s3527_s23, %s4649_s23   ;;  %s3458_s22 = sphi %s3525_s22, %s4648_s22   ;;  %s3454_s21 = sphi %s3523_s21, %s4647_s21   ;;  %s3450_s20 = sphi %s3521_s20, %s4646_s20   ;;  %s3446_s19 = sphi %s3519_s19, %s4645_s19   ;;  %s3442_s18 = sphi %s3517_s18, %s4644_s18  }
   0xf   : > { %4610 = sst [smem:[#allocation19_spill]] %s3458_s22  ;;  %s2728_s27 = sadd.s32 4294967294, %s3470_s25  }
  0x10   : > { %p57_p0 = scmp.ne.s32.totalorder %s3446_s19, %s3442_s18  ;;  %p3561_p1 = scmp.eq.s32.totalorder %s2727_s26, 0 }
  0x11   : > { %p3565_p2 = scmp.eq.s32.totalorder %s2727_s26, 3  ;;  %p173_p3 = scmp.eq.s32.totalorder %s2728_s27, 3 }
  0x12   : > { %s4611_s28 = scalar_select %p3561_p1, 1, 0 }
  0x13   : > { %s4612_s29 = scalar_select %p3565_p2, 1, 0 }
  0x14   : > { %p3571_p4 = por %p3561_p1, %p57_p0  ;;  %p2729_p5 = scmp.ge.s32.totalorder %s3470_s25, 1 }
  0x15   : > { %p3576_p6 = por %p173_p3, %p57_p0  ;;  %p180_p7 = scmp.lt.s32.totalorder %s3470_s25, 5 }
  0x16   : > { %s4613_s30 = scalar_select %p3571_p4, 1, 0 }
  0x17   : > { %s4614_s6 = scalar_select %p3576_p6, 1, 0 }
  0x18   : > { %p3581_p8 = pnand %p2729_p5, %p180_p7  ;;  %s3472_s8 = smov [#allocation7]  }
  0x19   : > { %4615 = sst [smem:[#allocation20_spill]] %s4614_s6  ;;  %s192_s9 = sshll.u32 %s3472_s8, 4  ;;  %s3585_s9 = int_to_ptr.vmem [resolvable:$true] %s192_s9 }
  0x1a   : > { %s4616_s7 = scalar_select %p3581_p8, 1, 0 }
  0x1b   : > { %p3008_p9 = pneg %p3581_p8  ;;  %s3473_s11 = smov [#allocation10]  }
  0x1c   : > { %s216_s12 = sshll.u32 %s3473_s11, 4  ;;  %s3474_s13 = smov [#allocation9]   ;;  %s3595_s12 = int_to_ptr.vmem [resolvable:$true] %s216_s12 }
  0x1d   : > { %p3591_p10 = pnand %p3008_p9, %p3561_p1  ;;  %s3597_s14 = sshll.u32 %s3474_s13, 4  ;;  %s207_s14 = int_to_ptr.vmem [resolvable:$true] %s3597_s14 }
  0x1e   : > { %s4618_s1 = sld [smem:[#allocation21_spill]] }
  0x1f   : > { %p3607_p12 = pneg %p3591_p10 }
  0x24   : > { %s3222_s17 = scalar_lea.hbm %s4618_s1, 256 }
  0x25   : > { %p3223_p11 = scmp.ne.s32.totalorder %s4618_s1, %s3222_s17  ;;  %p3229_p3 = scmp.lt.u32.totalorder %s3222_s17, %s4618_s1 }
  0x27   : > { %p3225_p13 = pnand %p3607_p12, %p3223_p11 }
  0x29   : > { %p3226_p0 = pneg %p3225_p13 }
  0x2b   : > { %p3231_p5 = pnand %p3229_p3, %p3226_p0 }
  0x2d   : > { %3234 = shalt.err (!%p3231_p5)
}
  0x2e   : > { %s3235_s15 = scalar_lea.vmem %s3585_s9, 256  ;;  %p3243_p1 = scmp.lt.s32.totalorder %s3585_s9, %s3585_s9 }
  0x2f   : > { %p3236_p7 = scmp.ne.s32.totalorder %s3585_s9, %s3235_s15  ;;  %p3244_p4 = scmp.lt.s32.totalorder %s3235_s15, %s3235_s15 }
  0x31   : > { %p3238_p9 = pnand %p3236_p7, %p3607_p12  ;;  %p3245_p11 = por %p3244_p4, %p3243_p1 }
  0x33   : > { %p3239_p6 = pneg %p3238_p9 }
  0x35   : > { %p3246_p13 = pnand %p3245_p11, %p3239_p6 }
  0x37   : > { %3249 = shalt.err (!%p3246_p13)
}
  0x38   : > { %s4603_s16 = smov 64   ;;  %s4604_s17 = smov 4  }
  0x39   : > { %3011 = dma.hbm_to_vmem [thread:$0]  (!%p3591_p10), %s4618_s1, 256, %s3585_s9, [#allocation8], %s4603_s16, %s4603_s16, %s4604_s17  }
  0x3a   : > { %s4620_s3 = sld [smem:[#allocation23_spill]] }
  0x40   : > { %s3250_s15 = scalar_lea.hbm %s4620_s3, 4608 }
  0x41   : > { %p3251_p1 = scmp.ne.s32.totalorder %s4620_s3, %s3250_s15  ;;  %p3257_p0 = scmp.lt.u32.totalorder %s3250_s15, %s4620_s3 }
  0x43   : > { %p3253_p4 = pnand %p3251_p1, %p3607_p12 }
  0x45   : > { %p3254_p6 = pneg %p3253_p4 }
  0x47   : > { %p3259_p3 = pnand %p3257_p0, %p3254_p6 }
  0x49   : > { %3262 = shalt.err (!%p3259_p3)
}
  0x4a   : > { %s3263_s9 = scalar_lea.vmem %s3595_s12, 4608  ;;  %p3271_p11 = scmp.lt.s32.totalorder %s3595_s12, %s3595_s12 }
  0x4b   : > { %p3264_p5 = scmp.ne.s32.totalorder %s3595_s12, %s3263_s9  ;;  %p3272_p13 = scmp.lt.s32.totalorder %s3263_s9, %s3263_s9 }
  0x4d   : > { %p3266_p7 = pnand %p3264_p5, %p3607_p12  ;;  %p3273_p1 = por %p3272_p13, %p3271_p11 }
  0x4f   : > { %p3267_p9 = pneg %p3266_p7 }
  0x51   : > { %p3274_p4 = pnand %p3273_p1, %p3267_p9 }
  0x53   : > { %3277 = shalt.err (!%p3274_p4)
}
  0x54   : > { %3017 = dma.hbm_to_vmem [thread:$0]  (!%p3591_p10), %s4620_s3, 4608, %s3595_s12, [#allocation11], %s4603_s16, %s4603_s16, %s4604_s17  }
  0x55   : > { %s4621_s2 = sld [smem:[#allocation22_spill]] }
  0x5b   : > { %s3278_s26 = scalar_lea.hbm %s4621_s2, 16 }
  0x5c   : > { %p3279_p6 = scmp.ne.s32.totalorder %s4621_s2, %s3278_s26  ;;  %p3285_p5 = scmp.lt.u32.totalorder %s3278_s26, %s4621_s2 }
  0x5e   : > { %p3281_p0 = pnand %p3279_p6, %p3607_p12 }
  0x60   : > { %p3282_p3 = pneg %p3281_p0 }
  0x62   : > { %p3287_p7 = pnand %p3285_p5, %p3282_p3 }
  0x64   : > { %3290 = shalt.err (!%p3287_p7)
}
  0x65   : > { %s3291_s9 = scalar_lea.vmem %s207_s14, 16  ;;  %s3298_s12 = scalar_lea.vmem %s207_s14, 32 }
  0x66   : > { %p3292_p9 = scmp.ne.s32.totalorder %s207_s14, %s3291_s9  ;;  %p3299_p1 = scmp.lt.s32.totalorder %s207_s14, %s207_s14 }
  0x67   : > { %p3300_p4 = scmp.lt.s32.totalorder %s3298_s12, %s3291_s9 }
  0x68   : > { %p3294_p11 = pnand %p3292_p9, %p3607_p12 }
  0x69   : > { %p3301_p8 = por %p3300_p4, %p3299_p1 }
  0x6a   : > { %p3295_p13 = pneg %p3294_p11 }
  0x6c   : > { %p3302_p2 = pnand %p3301_p8, %p3295_p13 }
  0x6e   : > { %3305 = shalt.err (!%p3302_p2)
}
  0x6f   : > { %3014 = dma.hbm_to_vmem [thread:$0]  (!%p3591_p10), %s4621_s2, 16, %s207_s14, [#allocation8]  }
  0x70   : > { %s3477_s22 = smov [#allocation12]   ;;  %s3306_s11 = scalar_lea.hbm %s4594_s4, 16 }
  0x71   : > { %s230_s6 = sshll.u32 %s3477_s22, 4  ;;  %p3307_p6 = scmp.ne.s32.totalorder %s4594_s4, %s3306_s11  ;;  %s231_s6 = int_to_ptr.vmem [resolvable:$true] %s230_s6 }
  0x72   : > { %p3313_p0 = scmp.lt.u32.totalorder %s3306_s11, %s4594_s4 }
  0x73   : > { %p3309_p2 = pnand %p3307_p6, %p3607_p12 }
  0x75   : > { %p3310_p8 = pneg %p3309_p2 }
  0x77   : > { %p3315_p3 = pnand %p3313_p0, %p3310_p8 }
  0x79   : > { %3318 = shalt.err (!%p3315_p3)
}
  0x7a   : > { %s3319_s14 = scalar_lea.vmem %s231_s6, 16  ;;  %s3326_s5 = scalar_lea.vmem %s231_s6, 32 }
  0x7b   : > { %p3320_p5 = scmp.ne.s32.totalorder %s231_s6, %s3319_s14  ;;  %p3327_p11 = scmp.lt.s32.totalorder %s231_s6, %s231_s6 }
  0x7c   : > { %p3328_p13 = scmp.lt.s32.totalorder %s3326_s5, %s3319_s14 }
  0x7d   : > { %p3322_p7 = pnand %p3320_p5, %p3607_p12 }
  0x7e   : > { %p3329_p1 = por %p3328_p13, %p3327_p11 }
  0x7f   : > { %p3323_p9 = pneg %p3322_p7 }
  0x81   : > { %p3330_p4 = pnand %p3329_p1, %p3323_p9 }
  0x83   : > { %3333 = shalt.err (!%p3330_p4)
}
  0x84   : > { %3020 = dma.hbm_to_vmem [thread:$0]  (!%p3591_p10), %s4594_s4, 16, %s231_s6, [#allocation11]  }
  0x85   : > { %s32_s8 = sadd.s32 1, %s3462_s23  ;;  %s35_s26 = sadd.s32 1, %s3466_s24 }
  0x86   : > { %p33_p12 = scmp.ge.s32.totalorder %s32_s8, 2  ;;  %s44_s10 = sadd.s32 1, %s3450_s20 }
  0x87   : > { %p51_p6 = scmp.ne.s32.totalorder %s3450_s20, %s3446_s19  ;;  %p52_p2 = scmp.eq.s32.totalorder %s3470_s25, 0 }
  0x88   : > { %s4652_s8 = smov (%p33_p12, %s32_s8), 0  ;;  %s4654_s26 = smov (!%p33_p12, %s35_s26), %s3466_s24 }
  0x89   : > { %s40_s27 = ssub.s32 %s3462_s23, %s4652_s8  ;;  %p3705_p8 = por %p52_p2, %p51_p6 }
  0x8a   : > { %p37_p10 = scmp.ge.s32.totalorder %s4654_s26, 2  ;;  %p4623_p0 = scmp.ne.s32.totalorder %s4612_s29, 0 }
  0x8b   : > { %p3033_p5 = scmp.lt.s32.totalorder %s3470_s25, 4  ;;  %s241_s13 = sand.u32 1, %s3450_s20  }
  0x8c   : > { %p3711_p3 = por %p4623_p0, %p51_p6  ;;  %s4656_s26 = smov (%p37_p10, %s4654_s26), 0 }
  0x8d   : > { %s2984_s15 = smul.u32 80, %s241_s13  ;;  %s39_s9 = ssub.s32 %s3466_s24, %s4656_s26 }
  0x8e   : > { %s2985_s12 = smul.u32 20, %s3462_s23  ;;  %s41_s14 = sor.u32 %s40_s27, %s39_s9 }
  0x8f   : > { %p42_p7 = scmp.eq.s32.totalorder %s41_s14, 0  ;;  %s2986_s5 = smul.u32 40, %s3466_s24 }
  0x90   : > { %s245_s18 = scalar_lea.vmem [#allocation4], %s2984_s15  ;;  %p3725_p9 = pnand %p3033_p5, %p3705_p8 }
  0x91   : > { %s254_s22 = sshll.u32 %s245_s18, 4  ;;  %s251_s17 = sadd.s32 %s2986_s5, %s2985_s12  ;;  %s3732_s22 = int_to_ptr.vmem [resolvable:$true] %s254_s22 }
  0x92   : > { %s3730_s16 = scalar_select %p42_p7, %s3450_s20, %s44_s10  }
  0x93   : > { %s2735_s1 = sshll.u32 %s251_s17, 6  ;;  %s3739_s11 = scalar_lea.sflag [#allocation5], %s241_s13 }
  0x94   : > { %s3737_s27 = scalar_lea.hbm %s4590_s0, %s2735_s1  ;;  %p3336_p13 = pneg %p3725_p9 }
  0x95   : > { %s3334_s15 = scalar_lea.hbm %s3737_s27, 1280  ;;  %s3339_s2 = scalar_lea.hbm %s4590_s0, 5120 }
  0x96   : > { %p3335_p11 = scmp.ne.s32.totalorder %s3737_s27, %s3334_s15  ;;  %p3340_p12 = scmp.lt.u32.totalorder %s3737_s27, %s4590_s0 }
  0x97   : > { %p3341_p6 = scmp.lt.u32.totalorder %s3339_s2, %s3334_s15  ;;  %p3343_p8 = scmp.lt.u32.totalorder %s3334_s15, %s3737_s27 }
  0x98   : > { %p3337_p1 = pnand %p3336_p13, %p3335_p11 }
  0x99   : > { %p3342_p2 = por %p3341_p6, %p3340_p12 }
  0x9a   : > { %p3338_p4 = pneg %p3337_p1 }
  0x9b   : > { %p3344_p10 = por %p3343_p8, %p3342_p2 }
  0x9d   : > { %p3345_p0 = pnand %p3344_p10, %p3338_p4 }
  0x9f   : > { %3348 = shalt.err (!%p3345_p0)
}
  0xa0   : > { %s3349_s13 = scalar_lea.vmem %s3732_s22, 1280  ;;  %s3478_s9 = smov [#allocation4]  }
  0xa1   : > { %p3350_p5 = scmp.ne.s32.totalorder %s3732_s22, %s3349_s13  ;;  %s3354_s12 = sshll.u32 %s3478_s9, 4  ;;  %s3355_s12 = int_to_ptr.vmem [resolvable:$false] %s3354_s12 }
  0xa2   : > { %s3356_s14 = scalar_lea.vmem %s3355_s12, 2560  ;;  %p3357_p1 = scmp.lt.s32.totalorder %s3732_s22, %s3355_s12 }
  0xa3   : > { %p3352_p7 = pnand %p3350_p5, %p3336_p13  ;;  %p3358_p12 = scmp.lt.s32.totalorder %s3356_s14, %s3349_s13 }
  0xa5   : > { %p3353_p11 = pneg %p3352_p7  ;;  %p3359_p6 = por %p3358_p12, %p3357_p1 }
  0xa7   : > { %p3360_p2 = pnand %p3359_p6, %p3353_p11 }
  0xa9   : > { %3363 = shalt.err (!%p3360_p2)
}
  0xaa   : > { %s4626_s5 = smov 4   ;;  %s4627_s18 = smov 64  }
  0xab   : > { %3024 = dma.hbm_to_vmem [thread:$0]  (!%p3725_p9), %s3737_s27, 1280, %s3732_s22, %s3739_s11, %s4627_s18, %s4627_s18, %s4626_s5  }
  0xac   : > { %p4628_p13 = scmp.ne.s32.totalorder %s4616_s7, 0 }
  0xad   : > { %s3773_s15 = sand.u32 (!%p4628_p13), 1, %s3446_s19   ;;  %p4629_p4 = scmp.ne.s32.totalorder (!%p4628_p13), %s4613_s30, 0 }
  0xae   : > { %266 = sbr.rel (%p4628_p13) target bundleno = 940 (0x3ac), region = 40  ;;  %s269_s10 = scalar_lea.sflag (!%p4628_p13), [#allocation5], %s3773_s15 }
  0xaf   : > { %s2987_s17 = smul.u32 (!%p4628_p13), 80, %s3773_s15 }
  0xb1   : > { %s3777_s2 = scalar_lea.vmem (!%p4628_p13), [#allocation4], %s2987_s17 }
  0xb5   : > { %3425 = dma.done.wait (%p4629_p4), %s269_s10, 1280  }
  0xb6   : > { %3427 = vsyncadd (%p4629_p4), %s269_s10, 4294966016  ;;  %p4630_p9 = scmp.ne.s32.totalorder %s4611_s28, 0 }
  0xb8   : > { %3429 = dma.done.wait (%p4630_p9), [#allocation8], 272  }
  0xb9   : > { %3431 = vsyncadd (%p4630_p9), [#allocation8], 4294967024 }
  0xba   : > { %3433 = dma.done.wait (%p4630_p9), [#allocation11], 4624  }
  0xbb   : > { %3435 = vsyncadd (%p4630_p9), [#allocation11], 4294962672  ;;  %s2741_s7 = sshll.u32 %s3773_s15, 7  ;;  %vm440_vm0 = vcmask 1044480   ;;  %vm441_vm1 = vcmask 1045504   ;;  %v3479_v0 = vmov 65535  }
  0xbc   : > { %v442_v1 = vsel %vm440_vm0, 4294967295, %v3479_v0  ;;  %vm409_vm2 = vcmask 220160   ;;  %v3116_v2 = vld [vmem:[#allocation7] sm:$0xff]   ;;  %v3117_v4 = vld [vmem:[#allocation7 + $0x8] sm:$0x3f]   ;;  %vm590_vm3 = vcmask 516096  }
  0xbd   : > { %v443_v3 = vsel %vm441_vm1, %v442_v1, 0  ;;  %2936 = vmatprep.subr.bf16.mxu0 %v3116_v2  ;;  %v3118_v5 = vld [vmem:[%s3777_s2] sm:$0xff]   ;;  %v3119_v7 = vld [vmem:[%s3777_s2 + $0x8] sm:$0xff]   ;;  %v3120_v8 = vld [vmem:[%s3777_s2 + $0x10] sm:$0xff]   ;;  %vm591_vm4 = vsmask.f32 256 }
  0xbe   : > { %2937 = vmatpush3.bf16.msra.mxu0 %v3116_v2  ;;  %v445_v6 = vand.u32 %v3117_v4, %v443_v3  ;;  %2940 = vmatprep.mubr.msk.bf16.mxu0 %vm409_vm2, %v3118_v5  ;;  %v3121_v9 = vld [vmem:[%s3777_s2 + $0x18] sm:$0xff]   ;;  %v3122_v10 = vld [vmem:[%s3777_s2 + $0x20] sm:$0xff]   ;;  %v3123_v11 = vld [vmem:[%s3777_s2 + $0x28] sm:$0xff]   ;;  %vm623_vm6 = vsmask.f32 7938  ;;  %vm907_vm8 = vcmask 519168  }
  0xbf   : > { %v3124_v12 = vld [vmem:[%s3777_s2 + $0x30] sm:$0xff]   ;;  %v3125_v13 = vld [vmem:[%s3777_s2 + $0x38] sm:$0xff]   ;;  %v3126_v14 = vld [vmem:[%s3777_s2 + $0x40] sm:$0xff]   ;;  %vm705_vm9 = vsmask.f32 4368  ;;  %s3982_s28 = scalar_lea.vmem [#allocation13], %s2741_s7 }
  0xc0   : > { %2938 = vmatprep.subr.bf16.mxu0 %v445_v6  ;;  %v3127_v15 = vld [vmem:[%s3777_s2 + $0x48] sm:$0xff]   ;;  %vm3814_vm5 = vmand %vm590_vm3, %vm591_vm4  ;;  %v596_v17 = vld [vmem:[#allocation2 + $0xc] sm:$0x1]  ;;  %p2785_p8 = scmp.ne.s32.totalorder %s3454_s21, 0 }
  0xc1   : > { %v597_v18 = vsel %vm3814_vm5, 0, %v596_v17  ;;  %vm3822_vm7 = vmand %vm590_vm3, %vm623_vm6  ;;  %v593_v20 = vld [vmem:[#allocation2] sm:$0x1]  ;;  %v628_v22 = vld [vmem:[#allocation2 + $0x14] sm:$0x1] }
  0xc2   : > { %2939 = vmatpush3.bf16.msra.mxu0 %v445_v6  ;;  %598 = vst [vmem:[#allocation2 + $0xc] sm:$0x1] %v597_v18  ;;  %v594_v21 = vsel %vm3814_vm5, 0, %v593_v20  ;;  %v629_v23 = vsel %vm3822_vm7, 0, %v628_v22  ;;  %v625_v24 = vld [vmem:[#allocation2 + $0x8] sm:$0x1]  ;;  %vm3873_vm10 = vmand %vm907_vm8, %vm623_vm6 }
  0xc3   : > { %595 = vst [vmem:[#allocation2] sm:$0x1] %v594_v21  ;;  %630 = vst [vmem:[#allocation2 + $0x14] sm:$0x1] %v629_v23  ;;  %v626_v25 = vsel %vm3822_vm7, 0, %v625_v24 }
  0xc4   : > { %627 = vst [vmem:[#allocation2 + $0x8] sm:$0x1] %v626_v25  ;;  %v602_v26 = vld [vmem:[#allocation2 + $0x24] sm:$0x1]  ;;  %v599_v28 = vld [vmem:[#allocation2 + $0x18] sm:$0x1]  ;;  %vm3880_vm11 = vmor %vm591_vm4, %vm705_vm9 }
  0xc5   : > { %2941 = vmatmul.mubr.msk.bf16.vlgmr.msra.gmra.mrb[0].mxu0 %vm409_vm2, %v3119_v7  ;;  %v603_v27 = vsel %vm3814_vm5, 0, %v602_v26  ;;  %v600_v29 = vsel %vm3814_vm5, 0, %v599_v28  ;;  %v634_v30 = vld [vmem:[#allocation2 + $0x2c] sm:$0x1]  ;;  %v631_v32 = vld [vmem:[#allocation2 + $0x20] sm:$0x1] }
  0xc6   : > { %2944 = vmatprep.mubr.msk.bf16.mxu0 %vm409_vm2, %v3120_v8  ;;  %604 = vst [vmem:[#allocation2 + $0x24] sm:$0x1] %v603_v27  ;;  %601 = vst [vmem:[#allocation2 + $0x18] sm:$0x1] %v600_v29  ;;  %v635_v31 = vsel %vm3822_vm7, 0, %v634_v30  ;;  %v632_v33 = vsel %vm3822_vm7, 0, %v631_v32 }
  0xc7   : > { %636 = vst [vmem:[#allocation2 + $0x2c] sm:$0x1] %v635_v31  ;;  %633 = vst [vmem:[#allocation2 + $0x20] sm:$0x1] %v632_v33  ;;  %v608_v34 = vld [vmem:[#allocation2 + $0x3c] sm:$0x1] }
  0xc8   : > { %v609_v35 = vsel %vm3814_vm5, 0, %v608_v34  ;;  %v605_v36 = vld [vmem:[#allocation2 + $0x30] sm:$0x1]  ;;  %v640_v38 = vld [vmem:[#allocation2 + $0x44] sm:$0x1] }
  0xc9   : > { %610 = vst [vmem:[#allocation2 + $0x3c] sm:$0x1] %v609_v35  ;;  %v606_v37 = vsel %vm3814_vm5, 0, %v605_v36  ;;  %v641_v39 = vsel %vm3822_vm7, 0, %v640_v38  ;;  %v637_v40 = vld [vmem:[#allocation2 + $0x38] sm:$0x1] }
  0xca   : > { %607 = vst [vmem:[#allocation2 + $0x30] sm:$0x1] %v606_v37  ;;  %642 = vst [vmem:[#allocation2 + $0x44] sm:$0x1] %v641_v39  ;;  %v638_v41 = vsel %vm3822_vm7, 0, %v637_v40 }
  0xcb   : > { %639 = vst [vmem:[#allocation2 + $0x38] sm:$0x1] %v638_v41  ;;  %v614_v42 = vld [vmem:[#allocation2 + $0x54] sm:$0x1]  ;;  %v611_v44 = vld [vmem:[#allocation2 + $0x48] sm:$0x1] }
  0xcc   : > { %v615_v43 = vsel %vm3814_vm5, 0, %v614_v42  ;;  %v612_v45 = vsel %vm3814_vm5, 0, %v611_v44  ;;  %v646_v46 = vld [vmem:[#allocation2 + $0x5c] sm:$0x1]  ;;  %v643_v48 = vld [vmem:[#allocation2 + $0x50] sm:$0x1] }
  0xcd   : > { %2945 = vmatmul.mubr.msk.bf16.gmra.mrb[4].mxu0 %vm409_vm2, %v3121_v9  ;;  %616 = vst [vmem:[#allocation2 + $0x54] sm:$0x1] %v615_v43  ;;  %613 = vst [vmem:[#allocation2 + $0x48] sm:$0x1] %v612_v45  ;;  %v647_v47 = vsel %vm3822_vm7, 0, %v646_v46  ;;  %v644_v49 = vsel %vm3822_vm7, 0, %v643_v48 }
  0xce   : > { %2948 = vmatprep.mubr.msk.bf16.mxu0 %vm409_vm2, %v3122_v10  ;;  %648 = vst [vmem:[#allocation2 + $0x5c] sm:$0x1] %v647_v47  ;;  %645 = vst [vmem:[#allocation2 + $0x50] sm:$0x1] %v644_v49  ;;  %v620_v50 = vld [vmem:[#allocation2 + $0x6c] sm:$0x1] }
  0xcf   : > { %v621_v51 = vsel %vm3814_vm5, 0, %v620_v50  ;;  %v617_v52 = vld [vmem:[#allocation2 + $0x60] sm:$0x1]  ;;  %v652_v54 = vld [vmem:[#allocation2 + $0x74] sm:$0x1] }
  0xd0   : > { %622 = vst [vmem:[#allocation2 + $0x6c] sm:$0x1] %v621_v51  ;;  %v618_v53 = vsel %vm3814_vm5, 0, %v617_v52  ;;  %v653_v55 = vsel %vm3822_vm7, 0, %v652_v54  ;;  %v649_v56 = vld [vmem:[#allocation2 + $0x68] sm:$0x1] }
  0xd1   : > { %619 = vst [vmem:[#allocation2 + $0x60] sm:$0x1] %v618_v53  ;;  %654 = vst [vmem:[#allocation2 + $0x74] sm:$0x1] %v653_v55  ;;  %v650_v57 = vsel %vm3822_vm7, 0, %v649_v56 }
  0xd2   : > { %651 = vst [vmem:[#allocation2 + $0x68] sm:$0x1] %v650_v57  ;;  %v3864_v58 = vld [vmem:[#allocation9] ss:$0 sm:$0xff]  ;;  %v917_v23 = vld [vmem:[#allocation2 + $0xc] sm:$0xf] }
  0xd3   : > { %v909_v31 = vld [vmem:[#allocation2] sm:$0xf]  ;;  %v921_v38 = vld [vmem:[#allocation2 + $0x14] sm:$0x1]  ;;  %v914_v44 = vld [vmem:[#allocation2 + $0x8] sm:$0x1] }
  0xd5   : > { %2949 = vmatmul.mubr.msk.bf16.gmra.mrb[8].mxu0 %vm409_vm2, %v3123_v11 }
  0xd6   : > { %2952 = vmatprep.mubr.msk.bf16.mxu0 %vm409_vm2, %v3124_v12 }
  0xdd   : > { %2953 = vmatmul.mubr.msk.bf16.gmra.mrb[12].mxu0 %vm409_vm2, %v3125_v13 }
  0xde   : > { %2956 = vmatprep.mubr.msk.bf16.mxu0 %vm409_vm2, %v3126_v14 }
  0xe5   : > { %2957 = vmatmul.mubr.msk.bf16.gmra.mrb[16].mxu0 %vm409_vm2, %v3127_v15 }
 0x198   : > { %v2942_v59 = vpop.f32.mrb[0].mxu0 }
 0x199   : > { %v490_v60 = vadd.f32 %v2942_v59, %v3864_v58  ;;  %v481_v61 = vpop.f32.mrb[1].mxu0 }
 0x19a   : > { %v482_v62 = vadd.f32 %v3864_v58, %v481_v61  ;;  %v2943_v63 = vpop.f32.mrb[2].mxu0 }
 0x19b   : > { %v562_v0 = vmax.f32 %v490_v60, 0.0  ;;  %v493_v1 = vadd.f32 %v2943_v63, %v3864_v58  ;;  %v484_v2 = vpop.f32.mrb[3].mxu0 }
 0x19c   : > { %v560_v3 = vmax.f32 %v482_v62, 0.0  ;;  %v485_v4 = vadd.f32 %v3864_v58, %v484_v2 }
 0x19d   : > { %v2905_v5 = vpack.c.bf16 %v562_v0, %v562_v0  ;;  %v563_v6 = vmax.f32 %v493_v1, 0.0  ;;  %v931_v0 = vld [vmem:[#allocation2 + $0x24] sm:$0xf] }
 0x19e   : > { %v2903_v7 = vpack.c.bf16 %v560_v3, %v560_v3  ;;  %v561_v8 = vmax.f32 %v485_v4, 0.0 }
 0x19f   : > { %v725_v9 = vshrl.u32 %v2905_v5, 16  ;;  %v2906_v10 = vpack.c.bf16 %v563_v6, %v563_v6  ;;  %v728_v11 = vshll.u32 %v2905_v5, 16 }
 0x1a0   : > { %v708_v12 = vshrl.u32 %v2903_v7, 16  ;;  %v711_v13 = vshll.u32 %v2903_v7, 16  ;;  %v2904_v14 = vpack.c.bf16 %v561_v8, %v561_v8  ;;  %v2946_v15 = vpop.f32.mrb[4].mxu0  ;;  %v924_v7 = vld [vmem:[#allocation2 + $0x18] sm:$0xf] }
 0x1a1   : > { %v727_v17 = vrot.slane %v725_v9, 7  ;;  %v733_v18 = vshrl.u32 %v2906_v10, 16  ;;  %v736_v19 = vshll.u32 %v2906_v10, 16  ;;  %v506_v20 = vadd.f32 %v2946_v15, %v3864_v58  ;;  %v497_v21 = vpop.f32.mrb[5].mxu0 }
 0x1a2   : > { %v710_v24 = vrot.slane %v708_v12, 7  ;;  %v716_v25 = vshrl.u32 %v2904_v14, 16  ;;  %v719_v26 = vshll.u32 %v2904_v14, 16  ;;  %v498_v27 = vadd.f32 %v3864_v58, %v497_v21  ;;  %v2947_v28 = vpop.f32.mrb[6].mxu0 }
 0x1a3   : > { %v730_v29 = vor.u32 %v728_v11, %v727_v17  ;;  %v731_v30 = vrot.slane %v727_v17, 4  ;;  %v735_v32 = vrot.slane %v733_v18, 7  ;;  %v566_v33 = vmax.f32 %v506_v20, 0.0  ;;  %v500_v34 = vpop.f32.mrb[7].mxu0 }
 0x1a4   : > { %v713_v35 = vor.u32 %v711_v13, %v710_v24  ;;  %v714_v36 = vrot.slane %v710_v24, 4  ;;  %v718_v39 = vrot.slane %v716_v25, 7  ;;  %v564_v40 = vmax.f32 %v498_v27, 0.0 }
 0x1a5   : > { %v918_v41 = vsel %vm3873_vm10, %v730_v29, %v917_v23  ;;  %v738_v42 = vor.u32 %v736_v19, %v735_v32  ;;  %v740_v43 = vrot.slane %v735_v32, 4  ;;  %v2909_v45 = vpack.c.bf16 %v566_v33, %v566_v33  ;;  %v935_v29 = vld [vmem:[#allocation2 + $0x2c] sm:$0x1] }
 0x1a6   : > { %919 = vst [vmem:[#allocation2 + $0xc] sm:$0xf] %v918_v41  ;;  %v910_v46 = vsel %vm3873_vm10, %v713_v35, %v909_v31  ;;  %v721_v47 = vor.u32 %v719_v26, %v718_v39  ;;  %v723_v48 = vrot.slane %v718_v39, 4  ;;  %v2907_v49 = vpack.c.bf16 %v564_v40, %v564_v40 }
 0x1a7   : > { %911 = vst [vmem:[#allocation2] sm:$0xf] %v910_v46  ;;  %v739_v50 = vsel %vm3880_vm11, %v731_v30, %v738_v42  ;;  %v922_v51 = vsel %vm3814_vm5, %v740_v43, %v921_v38  ;;  %v759_v52 = vshrl.u32 %v2909_v45, 16  ;;  %v762_v55 = vshll.u32 %v2909_v45, 16  ;;  %v928_v30 = vld [vmem:[#allocation2 + $0x20] sm:$0x1] }
 0x1a8   : > { %920 = vst.msk [vmem:[#allocation2 + $0x10] sm:$0xf] %vm907_vm8, %v739_v50  ;;  %923 = vst [vmem:[#allocation2 + $0x14] sm:$0x1] %v922_v51  ;;  %v722_v53 = vsel %vm3880_vm11, %v714_v36, %v721_v47  ;;  %v915_v54 = vsel %vm3814_vm5, %v723_v48, %v914_v44  ;;  %v742_v56 = vshrl.u32 %v2907_v49, 16  ;;  %v2950_v57 = vpop.f32.mrb[8].mxu0  ;;  %v509_v60 = vadd.f32 %v2947_v28, %v3864_v58 }
 0x1a9   : > { %913 = vst.msk [vmem:[#allocation2 + $0x4] sm:$0xf] %vm907_vm8, %v722_v53  ;;  %916 = vst [vmem:[#allocation2 + $0x8] sm:$0x1] %v915_v54  ;;  %v3898_v59 = vrot.slane %v759_v52, 7  ;;  %v501_v61 = vadd.f32 %v3864_v58, %v500_v34  ;;  %v522_v62 = vadd.f32 %v2950_v57, %v3864_v58  ;;  %v513_v63 = vpop.f32.mrb[9].mxu0 }
 0x1aa   : > { %v744_v1 = vrot.slane %v742_v56, 7  ;;  %v745_v2 = vshll.u32 %v2907_v49, 16  ;;  %v514_v3 = vadd.f32 %v3864_v58, %v513_v63  ;;  %v2951_v4 = vpop.f32.mrb[10].mxu0  ;;  %v567_v8 = vmax.f32 %v509_v60, 0.0  ;;  %v945_v43 = vld [vmem:[#allocation2 + $0x3c] sm:$0xf] }
 0x1ab   : > { %v764_v5 = vor.u32 %v762_v55, %v3898_v59  ;;  %v765_v6 = vrot.slane %v3898_v59, 4  ;;  %v565_v9 = vmax.f32 %v501_v61, 0.0  ;;  %v516_v10 = vpop.f32.mrb[11].mxu0  ;;  %v570_v13 = vmax.f32 %v522_v62, 0.0  ;;  %v938_v52 = vld [vmem:[#allocation2 + $0x30] sm:$0xf] }
 0x1ac   : > { %v747_v11 = vor.u32 %v745_v2, %v744_v1  ;;  %v748_v12 = vrot.slane %v744_v1, 4  ;;  %v568_v14 = vmax.f32 %v514_v3, 0.0  ;;  %v2910_v17 = vpack.c.bf16 %v567_v8, %v567_v8 }
 0x1ad   : > { %v932_v15 = vsel %vm3873_vm10, %v764_v5, %v931_v0  ;;  %v2908_v18 = vpack.c.bf16 %v565_v9, %v565_v9  ;;  %v525_v19 = vadd.f32 %v2951_v4, %v3864_v58  ;;  %v2913_v21 = vpack.c.bf16 %v570_v13, %v570_v13 }
 0x1ae   : > { %933 = vst [vmem:[#allocation2 + $0x24] sm:$0xf] %v932_v15  ;;  %v925_v20 = vsel %vm3873_vm10, %v747_v11, %v924_v7  ;;  %v2911_v23 = vpack.c.bf16 %v568_v14, %v568_v14  ;;  %v517_v24 = vadd.f32 %v3864_v58, %v516_v10  ;;  %v767_v25 = vshrl.u32 %v2910_v17, 16 }
 0x1af   : > { %926 = vst [vmem:[#allocation2 + $0x18] sm:$0xf] %v925_v20  ;;  %v770_v26 = vshll.u32 %v2910_v17, 16  ;;  %v750_v27 = vshrl.u32 %v2908_v18, 16  ;;  %v753_v28 = vshll.u32 %v2908_v18, 16  ;;  %v793_v31 = vshrl.u32 %v2913_v21, 16 }
 0x1b0   : > { %v796_v32 = vshll.u32 %v2913_v21, 16  ;;  %v776_v33 = vshrl.u32 %v2911_v23, 16  ;;  %v779_v34 = vshll.u32 %v2911_v23, 16  ;;  %v2954_v35 = vpop.f32.mrb[12].mxu0  ;;  %v769_v36 = vrot.slane %v767_v25, 7 }
 0x1b1   : > { %v752_v38 = vrot.slane %v750_v27, 7  ;;  %v571_v39 = vmax.f32 %v525_v19, 0.0  ;;  %v569_v40 = vmax.f32 %v517_v24, 0.0  ;;  %v529_v41 = vpop.f32.mrb[13].mxu0  ;;  %v3912_v42 = vrot.slane %v793_v31, 7 }
 0x1b2   : > { %v3914_v44 = vrot.slane %v776_v33, 7  ;;  %v538_v45 = vadd.f32 %v2954_v35, %v3864_v58  ;;  %v530_v46 = vadd.f32 %v3864_v58, %v529_v41  ;;  %v2955_v47 = vpop.f32.mrb[14].mxu0  ;;  %v772_v48 = vor.u32 %v770_v26, %v769_v36  ;;  %v942_v21 = vld [vmem:[#allocation2 + $0x38] sm:$0x1] }
 0x1b3   : > { %v774_v49 = vrot.slane %v769_v36, 4  ;;  %v755_v50 = vor.u32 %v753_v28, %v752_v38  ;;  %v757_v51 = vrot.slane %v752_v38, 4  ;;  %v532_v53 = vpop.f32.mrb[15].mxu0  ;;  %v798_v54 = vor.u32 %v796_v32, %v3912_v42 }
 0x1b4   : > { %v799_v55 = vrot.slane %v3912_v42, 4  ;;  %v781_v56 = vor.u32 %v779_v34, %v3914_v44  ;;  %v782_v57 = vrot.slane %v3914_v44, 4  ;;  %v773_v59 = vsel %vm3880_vm11, %v765_v6, %v772_v48  ;;  %v959_v44 = vld [vmem:[#allocation2 + $0x54] sm:$0xf] }
 0x1b5   : > { %v936_v60 = vsel %vm3814_vm5, %v774_v49, %v935_v29  ;;  %v756_v61 = vsel %vm3880_vm11, %v748_v12, %v755_v50  ;;  %v929_v62 = vsel %vm3814_vm5, %v757_v51, %v928_v30  ;;  %934 = vst.msk [vmem:[#allocation2 + $0x28] sm:$0xf] %vm907_vm8, %v773_v59  ;;  %v946_v63 = vsel %vm3873_vm10, %v798_v54, %v945_v43  ;;  %v949_v12 = vld [vmem:[#allocation2 + $0x44] sm:$0x1] }
 0x1b6   : > { %937 = vst [vmem:[#allocation2 + $0x2c] sm:$0x1] %v936_v60  ;;  %927 = vst.msk [vmem:[#allocation2 + $0x1c] sm:$0xf] %vm907_vm8, %v756_v61  ;;  %v939_v0 = vsel %vm3873_vm10, %v781_v56, %v938_v52  ;;  %v2914_v1 = vpack.c.bf16 %v571_v39, %v571_v39  ;;  %v2912_v2 = vpack.c.bf16 %v569_v40, %v569_v40  ;;  %v574_v3 = vmax.f32 %v538_v45, 0.0 }
 0x1b7   : > { %930 = vst [vmem:[#allocation2 + $0x20] sm:$0x1] %v929_v62  ;;  %947 = vst [vmem:[#allocation2 + $0x3c] sm:$0xf] %v946_v63  ;;  %v572_v4 = vmax.f32 %v530_v46, 0.0  ;;  %v541_v5 = vadd.f32 %v2955_v47, %v3864_v58  ;;  %v533_v6 = vadd.f32 %v3864_v58, %v532_v53 }
 0x1b8   : > { %940 = vst [vmem:[#allocation2 + $0x30] sm:$0xf] %v939_v0  ;;  %v801_v7 = vshrl.u32 %v2914_v1, 16  ;;  %v804_v8 = vshll.u32 %v2914_v1, 16  ;;  %v784_v9 = vshrl.u32 %v2912_v2, 16  ;;  %v787_v10 = vshll.u32 %v2912_v2, 16 }
 0x1b9   : > { %v2958_v11 = vpop.f32.mrb[16].mxu0  ;;  %v2917_v13 = vpack.c.bf16 %v574_v3, %v574_v3  ;;  %v2915_v14 = vpack.c.bf16 %v572_v4, %v572_v4  ;;  %v575_v15 = vmax.f32 %v541_v5, 0.0  ;;  %v573_v17 = vmax.f32 %v533_v6, 0.0  ;;  %v952_v45 = vld [vmem:[#allocation2 + $0x48] sm:$0xf] }
 0x1ba   : > { %v545_v18 = vpop.f32.mrb[17].mxu0  ;;  %v803_v19 = vrot.slane %v801_v7, 7  ;;  %v786_v20 = vrot.slane %v784_v9, 7  ;;  %v554_v23 = vadd.f32 %v2958_v11, %v3864_v58  ;;  %v963_v61 = vld [vmem:[#allocation2 + $0x5c] sm:$0x1] }
 0x1bb   : > { %v546_v24 = vadd.f32 %v3864_v58, %v545_v18  ;;  %v2959_v25 = vpop.f32.mrb[18].mxu0  ;;  %v827_v26 = vshrl.u32 %v2917_v13, 16  ;;  %v830_v27 = vshll.u32 %v2917_v13, 16  ;;  %v810_v28 = vshrl.u32 %v2915_v14, 16  ;;  %v956_v62 = vld [vmem:[#allocation2 + $0x50] sm:$0x1] }
 0x1bc   : > { %v813_v29 = vshll.u32 %v2915_v14, 16  ;;  %v548_v30 = vpop.f32.mrb[19].mxu0  ;;  %v806_v31 = vor.u32 %v804_v8, %v803_v19  ;;  %v808_v32 = vrot.slane %v803_v19, 4  ;;  %v789_v33 = vor.u32 %v787_v10, %v786_v20  ;;  %v973_v19 = vld [vmem:[#allocation2 + $0x6c] sm:$0xf] }
 0x1bd   : > { %v791_v34 = vrot.slane %v786_v20, 4  ;;  %v829_v35 = vrot.slane %v827_v26, 7  ;;  %v812_v36 = vrot.slane %v810_v28, 7  ;;  %v2918_v38 = vpack.c.bf16 %v575_v15, %v575_v15  ;;  %v966_v20 = vld [vmem:[#allocation2 + $0x60] sm:$0xf] }
 0x1be   : > { %v2916_v39 = vpack.c.bf16 %v573_v17, %v573_v17  ;;  %v807_v40 = vsel %vm3880_vm11, %v799_v55, %v806_v31  ;;  %v950_v41 = vsel %vm3814_vm5, %v808_v32, %v949_v12  ;;  %v790_v42 = vsel %vm3880_vm11, %v782_v57, %v789_v33 }
 0x1bf   : > { %v943_v43 = vsel %vm3814_vm5, %v791_v34, %v942_v21  ;;  %948 = vst.msk [vmem:[#allocation2 + $0x40] sm:$0xf] %vm907_vm8, %v807_v40  ;;  %951 = vst [vmem:[#allocation2 + $0x44] sm:$0x1] %v950_v41  ;;  %v832_v46 = vor.u32 %v830_v27, %v829_v35  ;;  %v815_v47 = vor.u32 %v813_v29, %v812_v36  ;;  %v833_v48 = vrot.slane %v829_v35, 4 }
 0x1c0   : > { %941 = vst.msk [vmem:[#allocation2 + $0x34] sm:$0xf] %vm907_vm8, %v790_v42  ;;  %944 = vst [vmem:[#allocation2 + $0x38] sm:$0x1] %v943_v43  ;;  %v816_v49 = vrot.slane %v812_v36, 4  ;;  %v835_v50 = vshrl.u32 %v2918_v38, 16  ;;  %v557_v1 = vadd.f32 %v2959_v25, %v3864_v58  ;;  %v549_v2 = vadd.f32 %v3864_v58, %v548_v30 }
 0x1c1   : > { %v818_v51 = vshrl.u32 %v2916_v39, 16  ;;  %v960_v52 = vsel %vm3873_vm10, %v832_v46, %v959_v44  ;;  %v953_v53 = vsel %vm3873_vm10, %v815_v47, %v952_v45  ;;  %v578_v54 = vmax.f32 %v554_v23, 0.0  ;;  %v977_v36 = vld [vmem:[#allocation2 + $0x74] sm:$0x1] }
 0x1c2   : > { %v576_v55 = vmax.f32 %v546_v24, 0.0  ;;  %961 = vst [vmem:[#allocation2 + $0x54] sm:$0xf] %v960_v52  ;;  %954 = vst [vmem:[#allocation2 + $0x48] sm:$0xf] %v953_v53  ;;  %v837_v56 = vrot.slane %v835_v50, 7 }
 0x1c3   : > { %v838_v57 = vshll.u32 %v2918_v38, 16  ;;  %v820_v59 = vrot.slane %v818_v51, 7  ;;  %v821_v60 = vshll.u32 %v2916_v39, 16  ;;  %v2921_v63 = vpack.c.bf16 %v578_v54, %v578_v54  ;;  %v970_v38 = vld [vmem:[#allocation2 + $0x68] sm:$0x1] }
 0x1c4   : > { %v2919_v0 = vpack.c.bf16 %v576_v55, %v576_v55  ;;  %v842_v4 = vrot.slane %v837_v56, 4  ;;  %v579_v17 = vmax.f32 %v557_v1, 0.0  ;;  %v577_v18 = vmax.f32 %v549_v2, 0.0 }
 0x1c5   : > { %v840_v3 = vor.u32 %v838_v57, %v837_v56  ;;  %v823_v5 = vor.u32 %v821_v60, %v820_v59  ;;  %v825_v6 = vrot.slane %v820_v59, 4  ;;  %v861_v7 = vshrl.u32 %v2921_v63, 16 }
 0x1c6   : > { %v864_v8 = vshll.u32 %v2921_v63, 16  ;;  %v844_v9 = vshrl.u32 %v2919_v0, 16  ;;  %v847_v10 = vshll.u32 %v2919_v0, 16  ;;  %v964_v12 = vsel %vm3814_vm5, %v842_v4, %v963_v61 }
 0x1c7   : > { %v841_v11 = vsel %vm3880_vm11, %v833_v48, %v840_v3  ;;  %v824_v13 = vsel %vm3880_vm11, %v816_v49, %v823_v5  ;;  %v957_v58 = vsel %vm3814_vm5, %v825_v6, %v956_v62  ;;  %965 = vst [vmem:[#allocation2 + $0x5c] sm:$0x1] %v964_v12  ;;  %v863_v14 = vrot.slane %v861_v7, 7 }
 0x1c8   : > { %962 = vst.msk [vmem:[#allocation2 + $0x58] sm:$0xf] %vm907_vm8, %v841_v11  ;;  %955 = vst.msk [vmem:[#allocation2 + $0x4c] sm:$0xf] %vm907_vm8, %v824_v13  ;;  %v846_v15 = vrot.slane %v844_v9, 7  ;;  %v2922_v24 = vpack.c.bf16 %v579_v17, %v579_v17  ;;  %v2920_v25 = vpack.c.bf16 %v577_v18, %v577_v18  ;;  %v3480_v46 = vmov (!%p2785_p8), 0  }
 0x1c9   : > { %958 = vst [vmem:[#allocation2 + $0x50] sm:$0x1] %v957_v58  ;;  %v866_v21 = vor.u32 %v864_v8, %v863_v14  ;;  %v867_v34 = vrot.slane %v863_v14, 4  ;;  %984 = vst.msk [vmem:[#allocation2] sm:$0xf] (!%p2785_p8), %vm907_vm8, %v3480_v46 }
 0x1ca   : > { %v849_v23 = vor.u32 %v847_v10, %v846_v15  ;;  %v869_v28 = vshrl.u32 %v2922_v24, 16  ;;  %v852_v29 = vshrl.u32 %v2920_v25, 16  ;;  %v872_v31 = vshll.u32 %v2922_v24, 16  ;;  %985 = vst.msk [vmem:[#allocation2 + $0x4] sm:$0xf] (!%p2785_p8), %vm907_vm8, %v3480_v46 }
 0x1cb   : > { %v974_v26 = vsel %vm3873_vm10, %v866_v21, %v973_v19  ;;  %v855_v33 = vshll.u32 %v2920_v25, 16  ;;  %v850_v35 = vrot.slane %v846_v15, 4  ;;  %987 = vst.msk [vmem:[#allocation2 + $0x8] sm:$0x1] (!%p2785_p8), %vm590_vm3, %v3480_v46 }
 0x1cc   : > { %v967_v27 = vsel %vm3873_vm10, %v849_v23, %v966_v20  ;;  %975 = vst [vmem:[#allocation2 + $0x6c] sm:$0xf] %v974_v26  ;;  %v871_v30 = vrot.slane %v869_v28, 7  ;;  %v854_v32 = vrot.slane %v852_v29, 7  ;;  %983 = sbr.rel (%p2785_p8) target bundleno = 467 (0x1d3), region = 64 }
 0x1cd   : > { %968 = vst [vmem:[#allocation2 + $0x60] sm:$0xf] %v967_v27 }
 0x1ce   : > { %v874_v39 = vor.u32 %v872_v31, %v871_v30  ;;  %v876_v40 = vrot.slane %v871_v30, 4  ;;  %v857_v41 = vor.u32 %v855_v33, %v854_v32  ;;  %v859_v42 = vrot.slane %v854_v32, 4 }
 0x1d0   : > { %v875_v22 = vsel %vm3880_vm11, %v867_v34, %v874_v39  ;;  %v978_v43 = vsel %vm3814_vm5, %v876_v40, %v977_v36  ;;  %v858_v44 = vsel %vm3880_vm11, %v850_v35, %v857_v41  ;;  %v971_v45 = vsel %vm3814_vm5, %v859_v42, %v970_v38 }
 0x1d1   : > { %976 = vst.msk [vmem:[#allocation2 + $0x70] sm:$0xf] %vm907_vm8, %v875_v22  ;;  %979 = vst [vmem:[#allocation2 + $0x74] sm:$0x1] %v978_v43 }
 0x1d2   : > { %969 = vst.msk [vmem:[#allocation2 + $0x64] sm:$0xf] %vm907_vm8, %v858_v44  ;;  %972 = vst [vmem:[#allocation2 + $0x68] sm:$0x1] %v971_v45 }
 0x1d3 PF: > { %p2786_p10 = scmp.ne.s32.totalorder %s3454_s21, 1 }
 0x1d4   : > { %v3481_v16 = vmov (!%p2786_p10), 0  }
 0x1d5   : > { %991 = sbr.rel (%p2786_p10) target bundleno = 476 (0x1dc), region = 68  ;;  %993 = vst.msk [vmem:[#allocation2 + $0x6c] sm:$0xf] (!%p2786_p10), %vm907_vm8, %v3481_v16  ;;  %994 = vst.msk [vmem:[#allocation2 + $0x70] sm:$0xf] (!%p2786_p10), %vm907_vm8, %v3481_v16 }
 0x1d6   : > { %996 = vst.msk [vmem:[#allocation2 + $0x74] sm:$0x1] (!%p2786_p10), %vm590_vm3, %v3481_v16 }
 0x1dc PF: > { %v3128_v37 = vld [vmem:[#allocation2 + $0x18] sm:$0xff]   ;;  %v3129_v47 = vld [vmem:[#allocation2 + $0x20] ss:$0 sps:$4 sm:$0x11]   ;;  %vm1085_vm12 = vsmask.f32 7424 }
 0x1dd   : > { %v3992_v48 = vld [vmem:[#allocation2] sm:$0xff]   ;;  %v1111_v49 = vshrl.u32 %v3128_v37, 16  ;;  %v1113_v50 = vshll.u32 %v3128_v37, 16  ;;  %v1118_v51 = vshll.u32 %v3129_v47, 16  ;;  %v3994_v52 = vld [vmem:[#allocation2 + $0xc] sm:$0xff]   ;;  %v4013_v10 = vld [vmem:[#allocation2 + $0x18] sm:$0xff]  }
 0x1de   : > { %v3996_v53 = vld [vmem:[#allocation2 + $0x8] ss:$0 sps:$4 sm:$0x11]   ;;  %v1087_v54 = vshrl.u32 %v3992_v48, 16  ;;  %v1089_v55 = vshll.u32 %v3992_v48, 16  ;;  %v4000_v56 = vld [vmem:[#allocation2 + $0xc] sm:$0xff]  }
 0x1df   : > { %v1115_v57 = vrot.slane %v1113_v50, 1  ;;  %v1120_v59 = vrot.slane %v1118_v51, 1  ;;  %v1094_v61 = vshll.u32 %v3996_v53, 16  ;;  %v1571_v62 = vshrl.u32 %v3994_v52, 16  ;;  %s3482_s30 = smov 64   ;;  %v4025_v24 = vld [vmem:[#allocation2 + $0x24] sm:$0xff]  }
 0x1e0   : > { %v1091_v60 = vrot.slane %v1089_v55, 1  ;;  %v1573_v63 = vshll.u32 %v3994_v52, 16  ;;  %v4005_v1 = vld [vmem:[#allocation2 + $0x14] ss:$0 sps:$4 sm:$0x11]   ;;  %v1099_v2 = vshrl.u32 %v4000_v56, 16 }
 0x1e1   : > { %v1116_v0 = vor.u32 %v1115_v57, %v1111_v49  ;;  %v1096_v4 = vrot.slane %v1094_v61, 1  ;;  %v1578_v7 = vshll.u32 %v4005_v1, 16  ;;  %v4010_v8 = vld [vmem:[#allocation2 + $0x14] ss:$0 sps:$4 sm:$0x11]   ;;  %v1101_v9 = vshll.u32 %v4000_v56, 16 }
 0x1e2   : > { %v1092_v3 = vor.u32 %v1091_v60, %v1087_v54  ;;  %v1575_v5 = vrot.slane %v1573_v63, 1  ;;  %v1106_v14 = vshll.u32 %v4010_v8, 16  ;;  %v4019_v15 = vld [vmem:[#allocation2 + $0x20] ss:$0 sps:$4 sm:$0x11]   ;;  %v1583_v17 = vshrl.u32 %v4013_v10, 16 }
 0x1e3   : > { %v1121_v6 = vsel %vm1085_vm12, %v1116_v0, %v1120_v59  ;;  %v1580_v13 = vrot.slane %v1578_v7, 1  ;;  %v1103_v58 = vrot.slane %v1101_v9, 1  ;;  %v1585_v18 = vshll.u32 %v4013_v10, 16  ;;  %v4027_v25 = vld [vmem:[#allocation2 + $0x24] sm:$0xff]   ;;  %v4035_v32 = vld [vmem:[#allocation2 + $0x30] sm:$0xff]   ;;  %v4052_v47 = vld [vmem:[#allocation2 + $0x3c] sm:$0xff]  }
 0x1e4   : > { %1186 = vrot.lane.b32.xlu1 %v1121_v6, %s3482_s30  ;;  %v1097_v11 = vsel %vm1085_vm12, %v1092_v3, %v1096_v4  ;;  %v1576_v12 = vor.u32 %v1575_v5, %v1571_v62  ;;  %v1108_v21 = vrot.slane %v1106_v14, 1  ;;  %v1590_v23 = vshll.u32 %v4019_v15, 16  ;;  %v4030_v27 = vld [vmem:[#allocation2 + $0x2c] ss:$0 sps:$4 sm:$0x11]   ;;  %v4050_v16 = vld [vmem:[#allocation2 + $0x30] sm:$0xff]  }
 0x1e5   : > { %1182 = vrot.lane.b32.xlu0 %v1097_v11, %s3482_s30  ;;  %v1104_v20 = vor.u32 %v1103_v58, %v1099_v2  ;;  %v1587_v26 = vrot.slane %v1585_v18, 1  ;;  %v1595_v30 = vshrl.u32 %v4025_v24, 16  ;;  %v1597_v31 = vshll.u32 %v4025_v24, 16  ;;  %v4039_v35 = vld [vmem:[#allocation2 + $0x2c] ss:$0 sps:$4 sm:$0x11]  }
 0x1e6   : > { %v1581_v19 = vsel %vm1085_vm12, %v1576_v12, %v1580_v13  ;;  %v1592_v29 = vrot.slane %v1590_v23, 1  ;;  %v1602_v34 = vshll.u32 %v4030_v27, 16  ;;  %v1123_v38 = vshrl.u32 %v4027_v25, 16  ;;  %v4047_v45 = vld [vmem:[#allocation2 + $0x38] ss:$0 sps:$4 sm:$0x11]  }
 0x1e7   : > { %v1109_v28 = vsel %vm1085_vm12, %v1104_v20, %v1108_v21  ;;  %v1588_v33 = vor.u32 %v1587_v26, %v1583_v17  ;;  %v1599_v36 = vrot.slane %v1597_v31, 1  ;;  %v1125_v39 = vshll.u32 %v4027_v25, 16  ;;  %v4056_v55 = vld [vmem:[#allocation2 + $0x38] ss:$0 sps:$4 sm:$0x11]   ;;  %v4068_v5 = vld [vmem:[#allocation2 + $0x3c] sm:$0xff]  }
 0x1e8   : > { %1666 = vrot.lane.b32.xlu1 %v1581_v19, %s3482_s30  ;;  %v1607_v40 = vshrl.u32 %v4035_v32, 16  ;;  %v1604_v42 = vrot.slane %v1602_v34, 1  ;;  %v1130_v22 = vshll.u32 %v4039_v35, 16  ;;  %v1609_v46 = vshll.u32 %v4035_v32, 16  ;;  %v4071_v9 = vld [vmem:[#allocation2 + $0x48] sm:$0xff]   ;;  %s4639_s22 = sld [smem:[#allocation19_spill]] }
 0x1e9   : > { %1184 = vrot.lane.b32.xlu0 %v1109_v28, %s3482_s30  ;;  %v1593_v41 = vsel %vm1085_vm12, %v1588_v33, %v1592_v29  ;;  %v1600_v43 = vor.u32 %v1599_v36, %v1595_v30  ;;  %v1127_v44 = vrot.slane %v1125_v39, 1  ;;  %v1614_v54 = vshll.u32 %v4047_v45, 16  ;;  %v4066_v4 = vld [vmem:[#allocation2 + $0x44] ss:$0 sps:$4 sm:$0x11]   ;;  %v4075_v14 = vld [vmem:[#allocation2 + $0x48] sm:$0xff]  }
 0x1ea   : > { %v1132_v37 = vrot.slane %v1130_v22, 1  ;;  %v1611_v51 = vrot.slane %v1609_v46, 1  ;;  %v1135_v57 = vshrl.u32 %v4050_v16, 16  ;;  %v1137_v59 = vshll.u32 %v4050_v16, 16  ;;  %v4097_v46 = vld [vmem:[#allocation2 + $0x54] sm:$0xff]   ;;  %s2923_s29 = sshll.u32 %s3454_s21, 4 }
 0x1eb   : > { %v1605_v49 = vsel %vm1085_vm12, %v1600_v43, %v1604_v42  ;;  %v1128_v50 = vor.u32 %v1127_v44, %v1123_v38  ;;  %v1619_v60 = vshrl.u32 %v4052_v47, 16  ;;  %v1616_v63 = vrot.slane %v1614_v54, 1  ;;  %v4078_v18 = vld [vmem:[#allocation2 + $0x44] ss:$0 sps:$4 sm:$0x11]   ;;  %s2599_s3 = sshll.u32 %s3982_s28, 4  ;;  %s4532_s3 = int_to_ptr.vmem [resolvable:$true] %s2599_s3 }
 0x1ec   : > { %1668 = vrot.lane.b32.xlu1 %v1593_v41, %s3482_s30  ;;  %v1612_v62 = vor.u32 %v1611_v51, %v1607_v40  ;;  %v1621_v0 = vshll.u32 %v4052_v47, 16  ;;  %v1139_v2 = vrot.slane %v1137_v59, 1  ;;  %v1142_v3 = vshll.u32 %v4056_v55, 16  ;;  %v4085_v29 = vld [vmem:[#allocation2 + $0x50] ss:$0 sps:$4 sm:$0x11]  }
 0x1ed   : > { %v1133_v61 = vsel %vm1085_vm12, %v1128_v50, %v1132_v37  ;;  %v1626_v13 = vshll.u32 %v4066_v4, 16  ;;  %v1147_v58 = vshrl.u32 %v4068_v5, 16  ;;  %v1149_v19 = vshll.u32 %v4068_v5, 16  ;;  %v4091_v39 = vld [vmem:[#allocation2 + $0x50] ss:$0 sps:$4 sm:$0x11]  }
 0x1ee   : > { %1188 = vrot.lane.b32.xlu0 %v1133_v61, %s3482_s30  ;;  %v1617_v6 = vsel %vm1085_vm12, %v1612_v62, %v1616_v63  ;;  %v1623_v7 = vrot.slane %v1621_v0, 1  ;;  %v1140_v11 = vor.u32 %v1139_v2, %v1135_v57  ;;  %v1144_v12 = vrot.slane %v1142_v3, 1  ;;  %v4099_v37 = vld [vmem:[#allocation2 + $0x54] sm:$0xff]   ;;  %v4102_v50 = vld [vmem:[#allocation2 + $0x5c] ss:$0 sps:$4 sm:$0x11]  }
 0x1ef   : > { %v1628_v21 = vrot.slane %v1626_v13, 1  ;;  %v1631_v23 = vshrl.u32 %v4071_v9, 16  ;;  %v1151_v26 = vrot.slane %v1149_v19, 1  ;;  %v1154_v28 = vshll.u32 %v4078_v18, 16  ;;  %s2899_s27 = sshll.u32 %s4639_s22, 5  ;;  %s4640_s9 = sld [smem:[#allocation24_spill]] }
 0x1f0   : > { %1670 = vrot.lane.b32.xlu1 %v1605_v49, %s3482_s30  ;;  %v1624_v17 = vor.u32 %v1623_v7, %v1619_v60  ;;  %v1145_v20 = vsel %vm1085_vm12, %v1140_v11, %v1144_v12  ;;  %v1633_v30 = vshll.u32 %v4071_v9, 16  ;;  %v1638_v38 = vshll.u32 %v4085_v29, 16  ;;  %v4107_v60 = vld [vmem:[#allocation2 + $0x60] sm:$0xff]   ;;  %v4111_v63 = vld [vmem:[#allocation2 + $0x5c] ss:$0 sps:$4 sm:$0x11]   ;;  %s2596_s11 = sadd.s32 %s2923_s29, %s2899_s27 }
 0x1f1   : > { %v1152_v33 = vor.u32 %v1151_v26, %v1147_v58  ;;  %v1156_v34 = vrot.slane %v1154_v28, 1  ;;  %v1159_v40 = vshrl.u32 %v4075_v14, 16  ;;  %v1161_v41 = vshll.u32 %v4075_v14, 16  ;;  %s2900_s1 = sshll.u32 %s2596_s11, 7  ;;  %s2583_s14 = scalar_lea.sflag [#allocation6], %s3773_s15 }
 0x1f2   : > { %1190 = vrot.lane.b32.xlu0 %v1145_v20, %s3482_s30  ;;  %v1629_v31 = vsel %vm1085_vm12, %v1624_v17, %v1628_v21  ;;  %v1635_v36 = vrot.slane %v1633_v30, 1  ;;  %v1640_v43 = vrot.slane %v1638_v38, 1  ;;  %v1166_v44 = vshll.u32 %v4091_v39, 16  ;;  %v4119_v17 = vld [vmem:[#allocation2 + $0x68] ss:$0 sps:$4 sm:$0x11]  }
 0x1f3   : > { %v1157_v42 = vsel %vm1085_vm12, %v1152_v33, %v1156_v34  ;;  %v1163_v49 = vrot.slane %v1161_v41, 1  ;;  %v1171_v57 = vshrl.u32 %v4097_v46, 16  ;;  %v1173_v59 = vshll.u32 %v4097_v46, 16  ;;  %v4122_v20 = vld [vmem:[#allocation2 + $0x3c] sm:$0xff]   ;;  %v3162_v38 = vld [vmem:[#allocation10] sm:$0xff]   ;;  %s3364_s5 = scalar_lea.vmem %s4532_s3, 2048 }
 0x1f4   : > { %1672 = vrot.lane.b32.xlu1 %v1617_v6, %s3482_s30  ;;  %v1636_v22 = vor.u32 %v1635_v36, %v1631_v23  ;;  %v1168_v54 = vrot.slane %v1166_v44, 1  ;;  %v1178_v62 = vshll.u32 %v4102_v50, 16  ;;  %v1643_v2 = vshrl.u32 %v4099_v37, 16  ;;  %v4128_v33 = vld [vmem:[#allocation2 + $0x44] ss:$0 sps:$4 sm:$0x11]   ;;  %p3365_p0 = scmp.ne.s32.totalorder %s4532_s3, %s3364_s5 }
 0x1f5   : > { %v1164_v61 = vor.u32 %v1163_v49, %v1159_v40  ;;  %v1175_v0 = vrot.slane %v1173_v59, 1  ;;  %v1645_v3 = vshll.u32 %v4099_v37, 16  ;;  %v1655_v6 = vshrl.u32 %v4107_v60, 16  ;;  %v4133_v41 = vld [vmem:[#allocation2 + $0x18] sm:$0xff]   ;;  %s4530_s12 = scalar_lea.hbm %s4640_s9, %s2900_s1  ;;  %s3484_s18 = smov [#allocation13]  }
 0x1f6   : > { %1192 = vrot.lane.b32.xlu0 %v1157_v42, %s3482_s30  ;;  %v1641_v51 = vsel %vm1085_vm12, %v1636_v22, %v1640_v43  ;;  %v1180_v11 = vrot.slane %v1178_v62, 1  ;;  %v1650_v12 = vshll.u32 %v4111_v63, 16  ;;  %v1657_v19 = vshll.u32 %v4107_v60, 16  ;;  %v4137_v49 = vld [vmem:[#allocation2 + $0x20] ss:$0 sps:$4 sm:$0x11]   ;;  %p3366_p5 = pnand %p3365_p0, %p3711_p3 }
 0x1f7   : > { %v1169_v7 = vsel %vm1085_vm12, %v1164_v61, %v1168_v54  ;;  %v1176_v13 = vor.u32 %v1175_v0, %v1171_v57  ;;  %v1647_v58 = vrot.slane %v1645_v3, 1  ;;  %v1662_v30 = vshll.u32 %v4119_v17, 16  ;;  %v3165_v57 = vld [vmem:[#allocation10 + $0x8] sm:$0xff]   ;;  %v4142_v62 = vld [vmem:[#allocation2 + $0x48] sm:$0xff]   ;;  %s3368_s17 = sshll.u32 %s3484_s18, 4  ;;  %s3369_s17 = int_to_ptr.vmem [resolvable:$false] %s3368_s17 }
 0x1f8   : > { %1674 = vrot.lane.b32.xlu1 %v1629_v31, %s3482_s30  ;;  %v1652_v21 = vrot.slane %v1650_v12, 1  ;;  %v1659_v28 = vrot.slane %v1657_v19, 1  ;;  %v3483_v31 = vmov 0   ;;  %v2122_v34 = vshrl.u32 %v4122_v20, 16  ;;  %p3367_p7 = pneg %p3366_p5  ;;  %s3370_s10 = scalar_lea.vmem %s3369_s17, 4096 }
 0x1f9   : > { %v1181_v23 = vsel %vm1085_vm12, %v1176_v13, %v1180_v11  ;;  %v1648_v26 = vor.u32 %v1647_v58, %v1643_v2  ;;  %1368 = vmatprep.subr.bf16.mxu1 %v3483_v31  ;;  %1851 = vmatprep.subr.bf16.mxu0 %v3483_v31  ;;  %v2124_v36 = vshll.u32 %v4122_v20, 16  ;;  %v1664_v40 = vrot.slane %v1662_v30, 1  ;;  %p3371_p11 = scmp.lt.s32.totalorder %s4532_s3, %s3369_s17  ;;  %p3372_p1 = scmp.lt.s32.totalorder %s3370_s10, %s3364_s5 }
 0x1fa   : > { %1194 = vrot.lane.b32.xlu0 %v1169_v7, %s3482_s30  ;;  %v1660_v22 = vor.u32 %v1659_v28, %v1655_v6  ;;  %v2129_v44 = vshll.u32 %v4128_v33, 16  ;;  %1369 = vmatpush1.bf16.msra.mxu1 %v3162_v38  ;;  %v2088_v54 = vshll.u32 %v4133_v41, 16  ;;  %v2093_v2 = vshll.u32 %v4137_v49, 16  ;;  %v4148_v7 = vld [vmem:[#allocation2 + $0x50] ss:$0 sps:$4 sm:$0x11]  }
 0x1fb   : > { %v1653_v42 = vsel %vm1085_vm12, %v1648_v26, %v1652_v21  ;;  %v2126_v43 = vrot.slane %v2124_v36, 1  ;;  %1370 = vmatprep.subr.bf16.mxu1 %v3483_v31  ;;  %v2134_v11 = vshrl.u32 %v4142_v62, 16  ;;  %v2136_v58 = vshll.u32 %v4142_v62, 16  ;;  %v3168_v21 = vld [vmem:[#allocation10 + $0x60] sm:$0xff]   ;;  %v3169_v26 = vld [vmem:[#allocation10 + $0x10] sm:$0xff]   ;;  %p3373_p12 = por %p3372_p1, %p3371_p11 }
 0x1fc   : > { %1676 = vrot.lane.b32.xlu1 %v1641_v51, %s3482_s30  ;;  %v2086_v51 = vshrl.u32 %v4133_v41, 16  ;;  %v2131_v61 = vrot.slane %v2129_v44, 1  ;;  %v2090_v0 = vrot.slane %v2088_v54, 1  ;;  %v1665_v3 = vsel %vm1085_vm12, %v1660_v22, %v1664_v40  ;;  %1852 = vmatpush1.bf16.msra.mxu0 %v3168_v21  ;;  %v4160_v38 = vld [vmem:[#allocation2 + $0x2c] ss:$0 sps:$4 sm:$0x11]  }
 0x1fd   : > { %v2127_v59 = vor.u32 %v2126_v43, %v2122_v34  ;;  %v2095_v13 = vrot.slane %v2093_v2, 1  ;;  %v2141_v19 = vshll.u32 %v4148_v7, 16  ;;  %v4157_v34 = vld [vmem:[#allocation2 + $0x24] sm:$0xff]   ;;  %1853 = vmatprep.subr.bf16.mxu0 %v3483_v31  ;;  %v3172_v40 = vld [vmem:[#allocation10 + $0x68] sm:$0xff]   ;;  %v2105_v44 = vshll.u32 %v4160_v38, 16  ;;  %p3374_p6 = pnand %p3373_p12, %p3367_p7 }
 0x1fe   : > { %1196 = vrot.lane.b32.xlu0 %v1181_v23, %s3482_s30  ;;  %1371 = vmatpush1.bf16.msra.mxu1 %v3165_v57  ;;  %v2091_v12 = vor.u32 %v2090_v0, %v2086_v51  ;;  %v2138_v23 = vrot.slane %v2136_v58, 1  ;;  %v2100_v22 = vshll.u32 %v4157_v34, 16  ;;  %v3173_v51 = vld [vmem:[#allocation10 + $0x18] sm:$0xff]   ;;  %v4169_v57 = vld [vmem:[#allocation2 + $0x54] sm:$0xff]   ;;  %vm1198_vm13 = vcmask 1046528  }
 0x1ff   : > { %v2132_v6 = vsel %vm1085_vm12, %v2127_v59, %v2131_v61  ;;  %1372 = vmatprep.subr.bf16.mxu1 %v3483_v31  ;;  %v2143_v30 = vrot.slane %v2141_v19, 1  ;;  %v2107_v59 = vrot.slane %v2105_v44, 1  ;;  %v4172_v61 = vld [vmem:[#allocation2 + $0x5c] ss:$0 sps:$4 sm:$0x11]   ;;  %v2146_v2 = vshrl.u32 %v4169_v57, 16 }
 0x200   : > { %2187 = vrot.lane.b32.xlu1 %v2132_v6, %s3482_s30  ;;  %v2096_v28 = vsel %vm1085_vm12, %v2091_v12, %v2095_v13  ;;  %v2139_v36 = vor.u32 %v2138_v23, %v2134_v11  ;;  %v2102_v54 = vrot.slane %v2100_v22, 1  ;;  %1854 = vmatpush1.bf16.msra.mxu0 %v3172_v40  ;;  %v3176_v6 = vld [vmem:[#allocation10 + $0x70] sm:$0xff]   ;;  %v3177_v11 = vld [vmem:[#allocation10 + $0x20] sm:$0xff]   ;;  %v2153_v12 = vshll.u32 %v4172_v61, 16  ;;  %v3180_v21 = vld [vmem:[#allocation10 + $0x78] sm:$0xff]  }
 0x201   : > { %1855 = vmatprep.subr.bf16.mxu0 %v3483_v31  ;;  %v4178_v13 = vld [vmem:[#allocation2 + $0x30] sm:$0xff]   ;;  %vm1223_vm14 = vcmask 523264  }
 0x202   : > { %1678 = vrot.lane.b32.xlu0 %v1653_v42, %s3482_s30  ;;  %1373 = vmatpush1.bf16.msra.mxu1 %v3169_v26  ;;  %v2098_v42 = vshrl.u32 %v4157_v34, 16  ;;  %v2144_v43 = vsel %vm1085_vm12, %v2139_v36, %v2143_v30  ;;  %v2155_v23 = vrot.slane %v2153_v12, 1  ;;  %v4182_v26 = vld [vmem:[#allocation2 + $0x38] ss:$0 sps:$4 sm:$0x11]   ;;  %v2112_v30 = vshll.u32 %v4178_v13, 16 }
 0x203   : > { %1374 = vmatprep.subr.bf16.mxu1 %v3483_v31  ;;  %v3181_v22 = vld [vmem:[#allocation10 + $0x28] sm:$0xff]  }
 0x204   : > { %2189 = vrot.lane.b32.xlu1 %v2144_v43, %s3482_s30  ;;  %v2103_v0 = vor.u32 %v2102_v54, %v2098_v42  ;;  %1856 = vmatpush1.bf16.msra.mxu0 %v3176_v6  ;;  %v2114_v40 = vrot.slane %v2112_v30, 1  ;;  %v2117_v42 = vshll.u32 %v4182_v26, 16  ;;  %v4189_v43 = vld [vmem:[#allocation2 + $0x60] sm:$0xff]  }
 0x205   : > { %1857 = vmatprep.subr.bf16.mxu0 %v3483_v31  ;;  %v3187_v30 = vld [vmem:[#allocation10 + $0x38] sm:$0xff]  }
 0x206   : > { %1680 = vrot.lane.b32.xlu0 %v1665_v3, %s3482_s30  ;;  %1375 = vmatpush1.bf16.msra.mxu1 %v3173_v51  ;;  %v2148_v3 = vshll.u32 %v4169_v57, 16  ;;  %v2108_v58 = vsel %vm1085_vm12, %v2103_v0, %v2107_v59  ;;  %v2119_v54 = vrot.slane %v2117_v42, 1  ;;  %v4193_v59 = vld [vmem:[#allocation2 + $0x68] ss:$0 sps:$4 sm:$0x11]   ;;  %v2158_v0 = vshrl.u32 %v4189_v43, 16 }
 0x207   : > { %1376 = vmatprep.subr.bf16.mxu1 %v3483_v31  ;;  %v2165_v12 = vshll.u32 %v4193_v59, 16  ;;  %v4207_v42 = vld [vmem:[#allocation2 + $0x6c] sm:$0xff]  }
 0x208   : > { %v2150_v19 = vrot.slane %v2148_v3, 1  ;;  %1858 = vmatpush1.bf16.msra.mxu0 %v3180_v21  ;;  %v3184_v3 = vld [vmem:[#allocation10 + $0x80] sm:$0xff]  }
 0x209   : > { %1859 = vmatprep.subr.bf16.mxu0 %v3483_v31 }
 0x20a   : > { %2181 = vrot.lane.b32.xlu0 %v2096_v28, %s3482_s30  ;;  %1377 = vmatpush1.bf16.msra.mxu1 %v3177_v11  ;;  %v2110_v28 = vshrl.u32 %v4178_v13, 16  ;;  %v2151_v36 = vor.u32 %v2150_v19, %v2146_v2  ;;  %v2160_v2 = vshll.u32 %v4189_v43, 16  ;;  %v1199_v19 = vrot.slane %v3992_v48, 1  ;;  %v3190_v48 = vld [vmem:[#allocation10 + $0x90] sm:$0xff]  }
 0x20b   : > { %1378 = vmatprep.subr.bf16.mxu1 %v3483_v31 }
 0x20c   : > { %v2156_v44 = vsel %vm1085_vm12, %v2151_v36, %v2155_v23  ;;  %v2115_v51 = vor.u32 %v2114_v40, %v2110_v28  ;;  %v2162_v11 = vrot.slane %v2160_v2, 1  ;;  %1860 = vmatpush1.bf16.msra.mxu0 %v3184_v3  ;;  %v2167_v23 = vrot.slane %v2165_v12, 1  ;;  %v3186_v28 = vld [vmem:[#allocation10 + $0x88] sm:$0xff]  }
 0x20d   : > { %2191 = vrot.lane.b32.xlu1 %v2156_v44, %s3482_s30  ;;  %1861 = vmatprep.subr.bf16.mxu0 %v3483_v31  ;;  %v1200_v36 = vrot.slane %v3996_v53, 1  ;;  %v2172_v53 = vshll.u32 %v4207_v42, 16  ;;  %v1682_v12 = vrot.slane %v3994_v52, 1  ;;  %v3195_v52 = vld [vmem:[#allocation10 + $0x50] sm:$0xff]  }
 0x20e   : > { %2183 = vrot.lane.b32.xlu0 %v2108_v58, %s3482_s30  ;;  %1379 = vmatpush1.bf16.msra.mxu1 %v3181_v22  ;;  %v2120_v6 = vsel %vm1085_vm12, %v2115_v51, %v2119_v54  ;;  %v3185_v58 = vld [vmem:[#allocation10 + $0x30] sm:$0xff]   ;;  %v2163_v21 = vor.u32 %v2162_v11, %v2158_v0  ;;  %v4209_v22 = vld [vmem:[#allocation2 + $0x74] ss:$0 sps:$4 sm:$0x11]   ;;  %v2170_v51 = vshrl.u32 %v4207_v42, 16  ;;  %v3191_v0 = vld [vmem:[#allocation10 + $0x40] sm:$0xff]  }
 0x20f   : > { %1380 = vmatprep.subr.bf16.mxu1 %v3483_v31  ;;  %v1201_v44 = vsel %vm1198_vm13, %v1199_v19, %v1200_v36  ;;  %v2177_v54 = vshll.u32 %v4209_v22, 16  ;;  %v2174_v2 = vrot.slane %v2172_v53, 1  ;;  %v1683_v19 = vrot.slane %v4005_v1, 1  ;;  %v3196_v1 = vld [vmem:[#allocation10 + $0xa8] sm:$0xff]   ;;  %v3198_v36 = vld [vmem:[#allocation10 + $0xb0] sm:$0xff]  }
 0x210   : > { %v2168_v40 = vsel %vm1085_vm12, %v2163_v21, %v2167_v23  ;;  %1862 = vmatpush1.bf16.msra.mxu0 %v3186_v28  ;;  %2815 = vmatprep.mubr.msk.bf16.mxu1 %vm1223_vm14, %v1201_v44  ;;  %v3194_v23 = vld [vmem:[#allocation10 + $0xa0] sm:$0xff]   ;;  %v1694_v44 = vrot.slane %v4052_v47, 1  ;;  %v1695_v53 = vrot.slane %v4066_v4, 1 }
 0x211   : > { %2193 = vrot.lane.b32.xlu1 %v2168_v40, %s3482_s30  ;;  %1863 = vmatprep.subr.bf16.mxu0 %v3483_v31  ;;  %v2179_v3 = vrot.slane %v2177_v54, 1  ;;  %v2175_v11 = vor.u32 %v2174_v2, %v2170_v51  ;;  %v1684_v28 = vsel %vm1198_vm13, %v1682_v12, %v1683_v19  ;;  %v1211_v40 = vrot.slane %v4050_v16, 1  ;;  %v3200_v2 = vld [vmem:[#allocation10 + $0xb8] sm:$0xff]  }
 0x212   : > { %2185 = vrot.lane.b32.xlu0 %v2120_v6, %s3482_s30  ;;  %1381 = vmatpush1.bf16.msra.mxu1 %v3185_v58  ;;  %v3192_v6 = vld [vmem:[#allocation10 + $0x98] sm:$0xff]   ;;  %v3193_v58 = vld [vmem:[#allocation10 + $0x48] sm:$0xff]   ;;  %v1214_v54 = vrot.slane %v4068_v5, 1  ;;  %v1697_v16 = vrot.slane %v4071_v9, 1  ;;  %v4245_v47 = vsel %vm1198_vm13, %v1694_v44, %v1695_v53  ;;  %v2212_v53 = vrot.slane %v4169_v57, 1 }
 0x213   : > { %1382 = vmatprep.subr.bf16.mxu1 %v3483_v31  ;;  %v2180_v21 = vsel %vm1085_vm12, %v2175_v11, %v2179_v3  ;;  %2851 = vmatprep.mubr.msk.bf16.mxu0 %vm1223_vm14, %v1684_v28  ;;  %v1217_v3 = vrot.slane %v4075_v14, 1  ;;  %v1700_v11 = vrot.slane %v4099_v37, 1  ;;  %v2206_v28 = vrot.slane %v4122_v20, 1 }
 0x214   : > { %1864 = vmatpush1.bf16.msra.mxu0 %v3190_v48  ;;  %v1212_v48 = vrot.slane %v4056_v55, 1  ;;  %v1698_v55 = vrot.slane %v4085_v29, 1  ;;  %v1701_v29 = vrot.slane %v4111_v63, 1  ;;  %v2197_v63 = vrot.slane %v4133_v41, 1 }
 0x215   : > { %1865 = vmatprep.subr.bf16.mxu0 %v3483_v31  ;;  %2195 = vrot.lane.b32.xlu1 %v2180_v21, %s3482_s30  ;;  %v1703_v21 = vrot.slane %v4107_v60, 1 }
 0x216   : > { %1383 = vmatpush1.bf16.msra.mxu1 %v3187_v30  ;;  %v3197_v30 = vld [vmem:[#allocation10 + $0x58] sm:$0xff]   ;;  %v4236_v51 = vsel %vm1198_vm13, %v1211_v40, %v1212_v48  ;;  %v4263_v19 = vsel %vm1198_vm13, %v1700_v11, %v1701_v29  ;;  %v2201_v48 = vrot.slane %v4160_v38, 1 }
 0x217   : > { %1384 = vmatprep.subr.bf16.mxu1 %v3483_v31 }
 0x218   : > { %1866 = vmatpush1.bf16.msra.mxu0 %v3192_v6  ;;  %v1218_v6 = vrot.slane %v4091_v39, 1  ;;  %v1221_v39 = vrot.slane %v4102_v50, 1 }
 0x219   : > { %1867 = vmatprep.subr.bf16.mxu0 %v3483_v31 }
 0x21a   : > { %1385 = vmatpush1.bf16.msra.mxu1 %v3191_v0  ;;  %v1215_v0 = vrot.slane %v4078_v18, 1  ;;  %v4254_v18 = vsel %vm1198_vm13, %v1697_v16, %v1698_v55  ;;  %v4259_v12 = vsel %vm1198_vm13, %v1217_v3, %v1218_v6  ;;  %v2204_v16 = vrot.slane %v4182_v26, 1 }
 0x21b   : > { %1386 = vmatprep.subr.bf16.mxu1 %v3483_v31  ;;  %v2215_v55 = vrot.slane %v4189_v43, 1  ;;  %v2218_v3 = vrot.slane %v4207_v42, 1  ;;  %v2219_v6 = vrot.slane %v4209_v22, 1  ;;  %v1202_v26 = vrot.slane %v4000_v56, 1 }
 0x21c   : > { %1868 = vmatpush1.bf16.msra.mxu0 %v3194_v23  ;;  %v4251_v4 = vsel %vm1198_vm13, %v1214_v54, %v1215_v0  ;;  %v1704_v23 = vrot.slane %v4119_v17, 1  ;;  %v2210_v17 = vrot.slane %v4148_v7, 1  ;;  %v2213_v54 = vrot.slane %v4172_v61, 1 }
 0x21d   : > { %1869 = vmatprep.subr.bf16.mxu0 %v3483_v31  ;;  %v2203_v0 = vrot.slane %v4178_v13, 1  ;;  %v4313_v29 = vsel %vm1198_vm13, %v2218_v3, %v2219_v6  ;;  %v1689_v3 = vrot.slane %v4030_v27, 1  ;;  %v1208_v27 = vrot.slane %v4027_v25, 1 }
 0x21e   : > { %1387 = vmatpush1.bf16.msra.mxu1 %v3193_v58  ;;  %v1220_v58 = vrot.slane %v4097_v46, 1  ;;  %v4277_v50 = vsel %vm1198_vm13, %v1703_v21, %v1704_v23  ;;  %v4302_v38 = vsel %vm1198_vm13, %v2212_v53, %v2213_v54  ;;  %v1685_v21 = vrot.slane %v4013_v10, 1 }
 0x21f   : > { %1388 = vmatprep.subr.bf16.mxu1 %v3483_v31  ;;  %v4307_v61 = vsel %vm1198_vm13, %v2203_v0, %v2204_v16  ;;  %v1686_v23 = vrot.slane %v4019_v15, 1  ;;  %v3214_v15 = vld [vmem:[#allocation2 + $0x18] sm:$0xff]   ;;  %v3216_v0 = vld [vmem:[#allocation2 + $0xc] sm:$0xff]  }
 0x220   : > { %1870 = vmatpush1.bf16.msra.mxu0 %v3196_v1  ;;  %v2198_v1 = vrot.slane %v4137_v49, 1  ;;  %v2200_v49 = vrot.slane %v4157_v34, 1 }
 0x221   : > { %1871 = vmatprep.subr.bf16.mxu0 %v3483_v31  ;;  %v1687_v56 = vsel %vm1198_vm13, %v1685_v21, %v1686_v23  ;;  %v1209_v21 = vrot.slane %v4039_v35, 1  ;;  %v3204_v23 = vld [vmem:[#allocation10 + $0xe0] sm:$0xff]  }
 0x222   : > { %1389 = vmatpush1.bf16.msra.mxu1 %v3195_v52  ;;  %v2207_v52 = vrot.slane %v4128_v33, 1  ;;  %v4285_v33 = vsel %vm1198_vm13, %v2197_v63, %v2198_v1  ;;  %v4296_v7 = vsel %vm1198_vm13, %v2200_v49, %v2201_v48  ;;  %v1205_v49 = vrot.slane %v3214_v15, 1  ;;  %v3215_v48 = vld [vmem:[#allocation2 + $0x20] ss:$0 sps:$4 sm:$0x11]  }
 0x223   : > { %1390 = vmatprep.subr.bf16.mxu1 %v3483_v31  ;;  %v1206_v53 = vrot.slane %v3215_v48, 1  ;;  %v1210_v25 = vsel %vm1198_vm13, %v1208_v27, %v1209_v21  ;;  %v3207_v48 = vld [vmem:[#allocation10 + $0xf8] sm:$0xff]  }
 0x224   : > { %1872 = vmatpush1.bf16.msra.mxu0 %v3198_v36  ;;  %v2209_v36 = vrot.slane %v4142_v62, 1  ;;  %v4282_v40 = vsel %vm1198_vm13, %v2206_v28, %v2207_v52  ;;  %v3212_v52 = vld [vmem:[#allocation2] sm:$0xff]  }
 0x225   : > { %1873 = vmatprep.subr.bf16.mxu0 %v3483_v31 }
 0x226   : > { %1391 = vmatpush1.bf16.msra.mxu1 %v3197_v30  ;;  %v4274_v30 = vsel %vm1198_vm13, %v1220_v58, %v1221_v39  ;;  %v4290_v44 = vsel %vm1198_vm13, %v2209_v36, %v2210_v17  ;;  %v3199_v39 = vld [vmem:[#allocation10 + $0xc0] sm:$0xff]   ;;  %v3201_v36 = vld [vmem:[#allocation10 + $0xc8] sm:$0xff]  }
 0x227   : > { %2960 = vmatprep.subr.bf16.mxu1 %v3483_v31 }
 0x228   : > { %1874 = vmatpush1.bf16.msra.mxu0 %v3200_v2  ;;  %v2216_v2 = vrot.slane %v4193_v59, 1  ;;  %v1203_v59 = vrot.slane %v4010_v8, 1  ;;  %v3213_v8 = vld [vmem:[#allocation2 + $0xc] sm:$0xff]  }
 0x229   : > { %2366 = vmatprep.subr.bf16.mxu0 %v3483_v31 }
 0x22a   : > { %v4310_v11 = vsel %vm1198_vm13, %v2215_v55, %v2216_v2  ;;  %v1204_v28 = vsel %vm1198_vm13, %v1202_v26, %v1203_v59  ;;  %v3202_v55 = vld [vmem:[#allocation10 + $0xd0] sm:$0xff]   ;;  %v1688_v2 = vrot.slane %v4025_v24, 1  ;;  %v1207_v26 = vsel %vm1198_vm13, %v1205_v49, %v1206_v53 }
 0x22c   : > { %v1690_v24 = vsel %vm1198_vm13, %v1688_v2, %v1689_v3  ;;  %v3209_v3 = vld [vmem:[#allocation10 + $0x108] sm:$0xff]  }
 0x256   : > { %v1187_v58 = vpop.permute.xlu1 %1186 }
 0x257   : > { %v1183_v22 = vpop.permute.xlu0 %1182  ;;  %v1231_v35 = vsel %vm1223_vm14, %v3214_v15, %v1187_v58  ;;  %v3218_v58 = vld [vmem:[#allocation2 + $0x24] sm:$0xff]   ;;  %v3219_v15 = vld [vmem:[#allocation2 + $0x30] sm:$0xff]  }
 0x258   : > { %v1225_v63 = vsel %vm1223_vm14, %v3212_v52, %v1183_v22  ;;  %v1691_v22 = vrot.slane %v4035_v32, 1  ;;  %v3217_v52 = vld [vmem:[#allocation2 + $0x24] sm:$0xff]  }
 0x259   : > { %1401 = vmatmul.mubr.bf16.vlgmr.msra.gmra.mrb[0].mxu1 %v1225_v63 }
 0x25a   : > { %2972 = vmatpush1.bf16.msra.mxu1 %v3199_v39  ;;  %v1667_v1 = vpop.permute.xlu1 %1666  ;;  %2816 = vmatprep.mubr.msk.bf16.mxu1 %vm1223_vm14, %v1204_v28  ;;  %v1692_v28 = vrot.slane %v4047_v45, 1 }
 0x25b   : > { %v1707_v17 = vsel %vm1223_vm14, %v3213_v8, %v1667_v1  ;;  %2961 = vmatprep.subr.bf16.mxu1 %v3483_v31  ;;  %v1185_v54 = vpop.permute.xlu0 %1184  ;;  %v3205_v1 = vld [vmem:[#allocation10 + $0xe8] sm:$0xff]   ;;  %v3206_v8 = vld [vmem:[#allocation10 + $0xf0] sm:$0xff]  }
 0x25c   : > { %1884 = vmatmul.mubr.bf16.vlgmr.msra.gmra.mrb[20].mxu0 %v1707_v17  ;;  %v1228_v16 = vsel %vm1223_vm14, %v3216_v0, %v1185_v54  ;;  %v1693_v32 = vsel %vm1198_vm13, %v1691_v22, %v1692_v28  ;;  %v3220_v54 = vld [vmem:[#allocation2 + $0x30] sm:$0xff]  }
 0x25d   : > { %2852 = vmatprep.mubr.msk.bf16.mxu0 %vm1223_vm14, %v1687_v56  ;;  %2367 = vmatpush1.bf16.msra.mxu0 %v3199_v39  ;;  %v3203_v39 = vld [vmem:[#allocation10 + $0xd8] sm:$0xff]  }
 0x25e   : > { %2973 = vmatpush1.bf16.msra.mxu1 %v3201_v36  ;;  %2368 = vmatprep.subr.bf16.mxu0 %v3483_v31  ;;  %v1669_v6 = vpop.permute.xlu1 %1668 }
 0x25f   : > { %2962 = vmatprep.subr.bf16.mxu1 %v3483_v31  ;;  %v1710_v59 = vsel %vm1223_vm14, %v4013_v10, %v1669_v6 }
 0x260   : > { %v1189_v45 = vpop.permute.xlu0 %1188 }
 0x261   : > { %1409 = vmatmul.mubr.bf16.gmra.mrb[4].mxu1 %v1228_v16  ;;  %2369 = vmatpush1.bf16.msra.mxu0 %v3201_v36  ;;  %v1234_v36 = vsel %vm1223_vm14, %v3218_v58, %v1189_v45 }
 0x262   : > { %2974 = vmatpush1.bf16.msra.mxu1 %v3202_v55  ;;  %2817 = vmatprep.mubr.msk.bf16.mxu1 %vm1223_vm14, %v1207_v26  ;;  %v1671_v10 = vpop.permute.xlu1 %1670 }
 0x263   : > { %2963 = vmatprep.subr.bf16.mxu1 %v3483_v31  ;;  %2370 = vmatprep.subr.bf16.mxu0 %v3483_v31  ;;  %v1713_v63 = vsel %vm1223_vm14, %v3217_v52, %v1671_v10 }
 0x264   : > { %1892 = vmatmul.mubr.bf16.gmra.mrb[24].mxu0 %v1710_v59  ;;  %v1191_v17 = vpop.permute.xlu0 %1190  ;;  %v3210_v59 = vld [vmem:[#allocation10 + $0x110] sm:$0xff]  }
 0x265   : > { %2853 = vmatprep.mubr.msk.bf16.mxu0 %vm1223_vm14, %v1690_v24  ;;  %2371 = vmatpush1.bf16.msra.mxu0 %v3202_v55  ;;  %v1237_v0 = vsel %vm1223_vm14, %v3220_v54, %v1191_v17  ;;  %v3208_v55 = vld [vmem:[#allocation10 + $0x100] sm:$0xff]  }
 0x266   : > { %2975 = vmatpush1.bf16.msra.mxu1 %v3203_v39  ;;  %2372 = vmatprep.subr.bf16.mxu0 %v3483_v31  ;;  %v1673_v56 = vpop.permute.xlu1 %1672 }
 0x267   : > { %2964 = vmatprep.subr.bf16.mxu1 %v3483_v31  ;;  %v1716_v49 = vsel %vm1223_vm14, %v3219_v15, %v1673_v56 }
 0x268   : > { %v1193_v53 = vpop.permute.xlu0 %1192 }
 0x269   : > { %1417 = vmatmul.mubr.bf16.gmra.mrb[8].mxu1 %v1231_v35  ;;  %2373 = vmatpush1.bf16.msra.mxu0 %v3203_v39  ;;  %v1240_v6 = vsel %vm1223_vm14, %v4068_v5, %v1193_v53 }
 0x26a   : > { %2976 = vmatpush1.bf16.msra.mxu1 %v3204_v23  ;;  %2818 = vmatprep.mubr.msk.bf16.mxu1 %vm1223_vm14, %v1210_v25  ;;  %v1675_v16 = vpop.permute.xlu1 %1674 }
 0x26b   : > { %2965 = vmatprep.subr.bf16.mxu1 %v3483_v31  ;;  %2374 = vmatprep.subr.bf16.mxu0 %v3483_v31 }
 0x26c   : > { %1900 = vmatmul.mubr.bf16.gmra.mrb[28].mxu0 %v1713_v63 }
 0x26d   : > { %2854 = vmatprep.mubr.msk.bf16.mxu0 %vm1223_vm14, %v1693_v32  ;;  %2375 = vmatpush1.bf16.msra.mxu0 %v3204_v23 }
 0x26e   : > { %2977 = vmatpush1.bf16.msra.mxu1 %v3205_v1  ;;  %2376 = vmatprep.subr.bf16.mxu0 %v3483_v31  ;;  %v1677_v26 = vpop.permute.xlu1 %1676 }
 0x26f   : > { %2966 = vmatprep.subr.bf16.mxu1 %v3483_v31  ;;  %v1722_v39 = vsel %vm1223_vm14, %v4071_v9, %v1677_v26 }
 0x271   : > { %1425 = vmatmul.mubr.bf16.gmra.mrb[12].mxu1 %v1234_v36  ;;  %2377 = vmatpush1.bf16.msra.mxu0 %v3205_v1 }
 0x272   : > { %2819 = vmatprep.mubr.msk.bf16.mxu1 %vm1223_vm14, %v4236_v51  ;;  %2978 = vmatpush1.bf16.msra.mxu1 %v3206_v8  ;;  %v3221_v51 = vld [vmem:[#allocation2 + $0x3c] sm:$0xff]  }
 0x273   : > { %2967 = vmatprep.subr.bf16.mxu1 %v3483_v31  ;;  %2378 = vmatprep.subr.bf16.mxu0 %v3483_v31  ;;  %v1719_v2 = vsel %vm1223_vm14, %v3221_v51, %v1675_v16 }
 0x274   : > { %1908 = vmatmul.mubr.bf16.gmra.mrb[32].mxu0 %v1716_v49 }
 0x275   : > { %2855 = vmatprep.mubr.msk.bf16.mxu0 %vm1223_vm14, %v4245_v47  ;;  %2379 = vmatpush1.bf16.msra.mxu0 %v3206_v8  ;;  %v1195_v47 = vpop.permute.xlu0 %1194 }
 0x276   : > { %2979 = vmatpush1.bf16.msra.mxu1 %v3207_v48  ;;  %2380 = vmatprep.subr.bf16.mxu0 %v3483_v31  ;;  %v1243_v5 = vsel %vm1223_vm14, %v4075_v14, %v1195_v47 }
 0x277   : > { %2968 = vmatprep.subr.bf16.mxu1 %v3483_v31 }
 0x279   : > { %1433 = vmatmul.mubr.bf16.gmra.mrb[16].mxu1 %v1237_v0  ;;  %2381 = vmatpush1.bf16.msra.mxu0 %v3207_v48 }
 0x27a   : > { %2820 = vmatprep.mubr.msk.bf16.mxu1 %vm1223_vm14, %v4251_v4  ;;  %2980 = vmatpush1.bf16.msra.mxu1 %v3208_v55  ;;  %v1197_v4 = vpop.permute.xlu0 %1196 }
 0x27b   : > { %2969 = vmatprep.subr.bf16.mxu1 %v3483_v31  ;;  %2382 = vmatprep.subr.bf16.mxu0 %v3483_v31 }
 0x27c   : > { %1916 = vmatmul.mubr.bf16.gmra.mrb[36].mxu0 %v1719_v2 }
 0x27d   : > { %2856 = vmatprep.mubr.msk.bf16.mxu0 %vm1223_vm14, %v4254_v18  ;;  %2383 = vmatpush1.bf16.msra.mxu0 %v3208_v55  ;;  %v3211_v18 = vld [vmem:[#allocation10 + $0x118] sm:$0xff]  }
 0x27e   : > { %2981 = vmatpush1.bf16.msra.mxu1 %v3209_v3  ;;  %2384 = vmatprep.subr.bf16.mxu0 %v3483_v31  ;;  %v1679_v24 = vpop.permute.xlu0 %1678 }
 0x27f   : > { %2970 = vmatprep.subr.bf16.mxu1 %v3483_v31  ;;  %v1725_v9 = vsel %vm1223_vm14, %v4099_v37, %v1679_v24  ;;  %v2188_v37 = vpop.permute.xlu1 %2187 }
 0x281   : > { %1441 = vmatmul.mubr.bf16.gmra.mrb[20].mxu1 %v1240_v6  ;;  %2385 = vmatpush1.bf16.msra.mxu0 %v3209_v3 }
 0x282   : > { %2821 = vmatprep.mubr.msk.bf16.mxu1 %vm1223_vm14, %v4259_v12  ;;  %2982 = vmatpush1.bf16.msra.mxu1 %v3210_v59  ;;  %v1246_v12 = vsel %vm1223_vm14, %v4097_v46, %v1197_v4  ;;  %v1681_v14 = vpop.permute.xlu0 %1680 }
 0x283   : > { %2971 = vmatprep.subr.bf16.mxu1 %v3483_v31  ;;  %2386 = vmatprep.subr.bf16.mxu0 %v3483_v31 }
 0x284   : > { %1924 = vmatmul.mubr.bf16.gmra.mrb[40].mxu0 %v1722_v39 }
 0x285   : > { %2857 = vmatprep.mubr.msk.bf16.mxu0 %vm1223_vm14, %v4263_v19  ;;  %2387 = vmatpush1.bf16.msra.mxu0 %v3210_v59  ;;  %v2231_v19 = vsel %vm1223_vm14, %v4122_v20, %v2188_v37 }
 0x286   : > { %2983 = vmatpush1.bf16.msra.mxu1 %v3211_v18  ;;  %2388 = vmatprep.subr.bf16.mxu0 %v3483_v31  ;;  %v1728_v31 = vsel %vm1223_vm14, %v4107_v60, %v1681_v14  ;;  %v2190_v60 = vpop.permute.xlu1 %2189 }
 0x289   : > { %1449 = vmatmul.mubr.bf16.gmra.mrb[24].mxu1 %v1243_v5  ;;  %2389 = vmatpush1.bf16.msra.mxu0 %v3211_v18 }
 0x28a   : > { %2822 = vmatprep.mubr.msk.bf16.mxu1 %vm1223_vm14, %v4274_v30  ;;  %v2182_v30 = vpop.permute.xlu0 %2181 }
 0x28b   : > { %v2222_v46 = vsel %vm1223_vm14, %v4133_v41, %v2182_v30  ;;  %v2192_v41 = vpop.permute.xlu1 %2191 }
 0x28c   : > { %1932 = vmatmul.mubr.bf16.gmra.mrb[44].mxu0 %v1725_v9 }
 0x28d   : > { %2858 = vmatprep.mubr.msk.bf16.mxu0 %vm1223_vm14, %v4277_v50  ;;  %v2234_v50 = vsel %vm1223_vm14, %v4142_v62, %v2190_v60 }
 0x291   : > { %1457 = vmatmul.mubr.bf16.gmra.mrb[28].mxu1 %v1246_v12 }
 0x292   : > { %2890 = vmatprep.mubr.msk.bf16.mxu1 %vm1223_vm14, %v4282_v40  ;;  %v2184_v40 = vpop.permute.xlu0 %2183 }
 0x293   : > { %v2225_v20 = vsel %vm1223_vm14, %v4157_v34, %v2184_v40  ;;  %v2194_v34 = vpop.permute.xlu1 %2193 }
 0x294   : > { %1940 = vmatmul.mubr.bf16.gmra.mrb[48].mxu0 %v1728_v31 }
 0x295   : > { %2887 = vmatprep.mubr.msk.bf16.mxu0 %vm1223_vm14, %v4285_v33  ;;  %v2237_v33 = vsel %vm1223_vm14, %v4169_v57, %v2192_v41 }
 0x299   : > { %2423 = vmatmul.mubr.bf16.vlgmr.msra.gmra.mrb[32].mxu1 %v2231_v19 }
 0x29a   : > { %2891 = vmatprep.mubr.msk.bf16.mxu1 %vm1223_vm14, %v4290_v44  ;;  %v2186_v44 = vpop.permute.xlu0 %2185 }
 0x29b   : > { %v2228_v62 = vsel %vm1223_vm14, %v4178_v13, %v2186_v44 }
 0x29c   : > { %2399 = vmatmul.mubr.bf16.vlgmr.msra.gmra.mrb[52].mxu0 %v2222_v46 }
 0x29d   : > { %2888 = vmatprep.mubr.msk.bf16.mxu0 %vm1223_vm14, %v4296_v7  ;;  %v2240_v7 = vsel %vm1223_vm14, %v4189_v43, %v2194_v34 }
 0x2a1   : > { %2431 = vmatmul.mubr.bf16.gmra.mrb[36].mxu1 %v2234_v50 }
 0x2a2   : > { %2892 = vmatprep.mubr.msk.bf16.mxu1 %vm1223_vm14, %v4302_v38  ;;  %v2196_v38 = vpop.permute.xlu1 %2195 }
 0x2a3   : > { %v2243_v57 = vsel %vm1223_vm14, %v4207_v42, %v2196_v38 }
 0x2a4   : > { %2407 = vmatmul.mubr.bf16.gmra.mrb[56].mxu0 %v2225_v20 }
 0x2a5   : > { %2889 = vmatprep.mubr.msk.bf16.mxu0 %vm1223_vm14, %v4307_v61 }
 0x2a9   : > { %2439 = vmatmul.mubr.bf16.gmra.mrb[40].mxu1 %v2237_v33 }
 0x2aa   : > { %2893 = vmatprep.mubr.msk.bf16.mxu1 %vm1223_vm14, %v4310_v11 }
 0x2ac   : > { %2415 = vmatmul.mubr.bf16.gmra.mrb[60].mxu0 %v2228_v62 }
 0x2b1   : > { %2447 = vmatmul.mubr.bf16.gmra.mrb[44].mxu1 %v2240_v7 }
 0x2b2   : > { %2894 = vmatprep.mubr.msk.bf16.mxu1 %vm1223_vm14, %v4313_v29 }
 0x2b9   : > { %2455 = vmatmul.mubr.bf16.gmra.mrb[48].mxu1 %v2243_v57 }
 0x32c   : > { %v1402_v61 = vpop.f32.mrb[0].mxu1 }
 0x32d   : > { %1465 = vst.msk [vmem:[#allocation3] sm:$0xff] %vm1223_vm14, %v1402_v61  ;;  %v1404_v13 = vpop.f32.mrb[1].mxu1 }
 0x32e   : > { %v1405_v27 = vpop.f32.mrb[2].mxu1 }
 0x32f   : > { %1466 = vst.msk [vmem:[#allocation3 + $0x8] sm:$0xff] %vm1223_vm14, %v1405_v27  ;;  %v1407_v11 = vpop.f32.mrb[3].mxu1  ;;  %v1885_v21 = vpop.f32.mrb[20].mxu0 }
 0x330   : > { %v1887_v10 = vpop.f32.mrb[21].mxu0 }
 0x331   : > { %v1888_v43 = vpop.f32.mrb[22].mxu0 }
 0x332   : > { %v1890_v23 = vpop.f32.mrb[23].mxu0 }
 0x334   : > { %v1410_v22 = vpop.f32.mrb[4].mxu1  ;;  %v1948_v28 = vld [vmem:[#allocation3] sm:$0xff] }
 0x335   : > { %1467 = vst.msk [vmem:[#allocation3 + $0x10] sm:$0xff] %vm1223_vm14, %v1410_v22  ;;  %v1964_v29 = vadd.f32 %v1948_v28, %v1885_v21  ;;  %v1412_v25 = vpop.f32.mrb[5].mxu1 }
 0x336   : > { %v1413_v42 = vpop.f32.mrb[6].mxu1  ;;  %v1949_v35 = vld [vmem:[#allocation3 + $0x8] sm:$0xff] }
 0x337   : > { %1980 = vst.msk [vmem:[#allocation3] sm:$0xff] %vm1223_vm14, %v1964_v29  ;;  %1468 = vst.msk [vmem:[#allocation3 + $0x18] sm:$0xff] %vm1223_vm14, %v1413_v42  ;;  %v1965_v52 = vadd.f32 %v1949_v35, %v1888_v43  ;;  %v1415_v63 = vpop.f32.mrb[7].mxu1  ;;  %v1893_v32 = vpop.f32.mrb[24].mxu0 }
 0x338   : > { %v1895_v1 = vpop.f32.mrb[25].mxu0 }
 0x339   : > { %1981 = vst.msk [vmem:[#allocation3 + $0x8] sm:$0xff] %vm1223_vm14, %v1965_v52  ;;  %v1896_v45 = vpop.f32.mrb[26].mxu0 }
 0x33a   : > { %v1898_v58 = vpop.f32.mrb[27].mxu0 }
 0x33c   : > { %v1418_v36 = vpop.f32.mrb[8].mxu1  ;;  %v1950_v56 = vld [vmem:[#allocation3 + $0x10] sm:$0xff] }
 0x33d   : > { %1469 = vst.msk [vmem:[#allocation3 + $0x20] sm:$0xff] %vm1223_vm14, %v1418_v36  ;;  %v1966_v8 = vadd.f32 %v1950_v56, %v1893_v32  ;;  %v1420_v17 = vpop.f32.mrb[9].mxu1 }
 0x33e   : > { %v1421_v15 = vpop.f32.mrb[10].mxu1  ;;  %v1951_v49 = vld [vmem:[#allocation3 + $0x18] sm:$0xff] }
 0x33f   : > { %1982 = vst.msk [vmem:[#allocation3 + $0x10] sm:$0xff] %vm1223_vm14, %v1966_v8  ;;  %1470 = vst.msk [vmem:[#allocation3 + $0x28] sm:$0xff] %vm1223_vm14, %v1421_v15  ;;  %v1967_v48 = vadd.f32 %v1951_v49, %v1896_v45  ;;  %v1423_v53 = vpop.f32.mrb[11].mxu1  ;;  %v1901_v54 = vpop.f32.mrb[28].mxu0 }
 0x340   : > { %v1903_v0 = vpop.f32.mrb[29].mxu0 }
 0x341   : > { %1983 = vst.msk [vmem:[#allocation3 + $0x18] sm:$0xff] %vm1223_vm14, %v1967_v48  ;;  %v1904_v16 = vpop.f32.mrb[30].mxu0 }
 0x342   : > { %v1906_v55 = vpop.f32.mrb[31].mxu0 }
 0x344   : > { %v1426_v51 = vpop.f32.mrb[12].mxu1  ;;  %v1952_v2 = vld [vmem:[#allocation3 + $0x20] sm:$0xff] }
 0x345   : > { %1471 = vst.msk [vmem:[#allocation3 + $0x30] sm:$0xff] %vm1223_vm14, %v1426_v51  ;;  %v1968_v47 = vadd.f32 %v1952_v2, %v1901_v54  ;;  %v1428_v3 = vpop.f32.mrb[13].mxu1 }
 0x346   : > { %v1429_v6 = vpop.f32.mrb[14].mxu1  ;;  %v1953_v26 = vld [vmem:[#allocation3 + $0x28] sm:$0xff] }
 0x347   : > { %1984 = vst.msk [vmem:[#allocation3 + $0x20] sm:$0xff] %vm1223_vm14, %v1968_v47  ;;  %1472 = vst.msk [vmem:[#allocation3 + $0x38] sm:$0xff] %vm1223_vm14, %v1429_v6  ;;  %v1969_v59 = vadd.f32 %v1953_v26, %v1904_v16  ;;  %v1431_v4 = vpop.f32.mrb[15].mxu1  ;;  %v1909_v39 = vpop.f32.mrb[32].mxu0 }
 0x348   : > { %v1911_v18 = vpop.f32.mrb[33].mxu0 }
 0x349   : > { %1985 = vst.msk [vmem:[#allocation3 + $0x28] sm:$0xff] %vm1223_vm14, %v1969_v59  ;;  %v1912_v5 = vpop.f32.mrb[34].mxu0  ;;  %v2463_v18 = vld [vmem:[#allocation3] sm:$0xff] }
 0x34a   : > { %v1914_v24 = vpop.f32.mrb[35].mxu0 }
 0x34c   : > { %v1434_v9 = vpop.f32.mrb[16].mxu1  ;;  %v1954_v12 = vld [vmem:[#allocation3 + $0x30] sm:$0xff] }
 0x34d   : > { %1473 = vst.msk [vmem:[#allocation3 + $0x40] sm:$0xff] %vm1223_vm14, %v1434_v9  ;;  %v1970_v14 = vadd.f32 %v1954_v12, %v1909_v39  ;;  %v1436_v31 = vpop.f32.mrb[17].mxu1  ;;  %v2464_v12 = vld [vmem:[#allocation3 + $0x8] sm:$0xff] }
 0x34e   : > { %v1437_v37 = vpop.f32.mrb[18].mxu1  ;;  %v1955_v19 = vld [vmem:[#allocation3 + $0x38] sm:$0xff] }
 0x34f   : > { %1986 = vst.msk [vmem:[#allocation3 + $0x30] sm:$0xff] %vm1223_vm14, %v1970_v14  ;;  %1474 = vst.msk [vmem:[#allocation3 + $0x48] sm:$0xff] %vm1223_vm14, %v1437_v37  ;;  %v1971_v30 = vadd.f32 %v1955_v19, %v1912_v5  ;;  %v1439_v46 = vpop.f32.mrb[19].mxu1  ;;  %v1917_v60 = vpop.f32.mrb[36].mxu0  ;;  %v4465_v37 = vld [vmem:[#allocation12] ss:$0 sm:$0xff] }
 0x350   : > { %v1919_v50 = vpop.f32.mrb[37].mxu0 }
 0x351   : > { %1987 = vst.msk [vmem:[#allocation3 + $0x38] sm:$0xff] %vm1223_vm14, %v1971_v30  ;;  %v1920_v40 = vpop.f32.mrb[38].mxu0 }
 0x352   : > { %v1922_v20 = vpop.f32.mrb[39].mxu0 }
 0x354   : > { %v1442_v41 = vpop.f32.mrb[20].mxu1  ;;  %v1956_v33 = vld [vmem:[#allocation3 + $0x40] sm:$0xff] }
 0x355   : > { %1475 = vst.msk [vmem:[#allocation3 + $0x50] sm:$0xff] %vm1223_vm14, %v1442_v41  ;;  %v1972_v44 = vadd.f32 %v1956_v33, %v1917_v60  ;;  %v1444_v62 = vpop.f32.mrb[21].mxu1 }
 0x356   : > { %v1445_v34 = vpop.f32.mrb[22].mxu1  ;;  %v1957_v7 = vld [vmem:[#allocation3 + $0x48] sm:$0xff]  ;;  %v2469_v16 = vld [vmem:[#allocation3 + $0x30] sm:$0xff] }
 0x357   : > { %1988 = vst.msk [vmem:[#allocation3 + $0x40] sm:$0xff] %vm1223_vm14, %v1972_v44  ;;  %1476 = vst.msk [vmem:[#allocation3 + $0x58] sm:$0xff] %vm1223_vm14, %v1445_v34  ;;  %v1973_v38 = vadd.f32 %v1957_v7, %v1920_v40  ;;  %v1447_v57 = vpop.f32.mrb[23].mxu1  ;;  %v1925_v61 = vpop.f32.mrb[40].mxu0  ;;  %v2465_v34 = vld [vmem:[#allocation3 + $0x10] sm:$0xff] }
 0x358   : > { %v1927_v13 = vpop.f32.mrb[41].mxu0  ;;  %v2470_v6 = vld [vmem:[#allocation3 + $0x38] sm:$0xff] }
 0x359   : > { %1989 = vst.msk [vmem:[#allocation3 + $0x48] sm:$0xff] %vm1223_vm14, %v1973_v38  ;;  %v1928_v27 = vpop.f32.mrb[42].mxu0 }
 0x35a   : > { %v1930_v11 = vpop.f32.mrb[43].mxu0 }
 0x35c   : > { %v1450_v21 = vpop.f32.mrb[24].mxu1  ;;  %v1958_v10 = vld [vmem:[#allocation3 + $0x50] sm:$0xff] }
 0x35d   : > { %1477 = vst.msk [vmem:[#allocation3 + $0x60] sm:$0xff] %vm1223_vm14, %v1450_v21  ;;  %v1974_v43 = vadd.f32 %v1958_v10, %v1925_v61  ;;  %v1452_v23 = vpop.f32.mrb[25].mxu1  ;;  %v2466_v21 = vld [vmem:[#allocation3 + $0x18] sm:$0xff] }
 0x35e   : > { %v1453_v22 = vpop.f32.mrb[26].mxu1  ;;  %v1959_v28 = vld [vmem:[#allocation3 + $0x58] sm:$0xff]  ;;  %v2471_v30 = vld [vmem:[#allocation3 + $0x40] sm:$0xff] }
 0x35f   : > { %1990 = vst.msk [vmem:[#allocation3 + $0x50] sm:$0xff] %vm1223_vm14, %v1974_v43  ;;  %1478 = vst.msk [vmem:[#allocation3 + $0x68] sm:$0xff] %vm1223_vm14, %v1453_v22  ;;  %v1975_v29 = vadd.f32 %v1959_v28, %v1928_v27  ;;  %v1455_v25 = vpop.f32.mrb[27].mxu1  ;;  %v1933_v42 = vpop.f32.mrb[44].mxu0 }
 0x360   : > { %v1935_v35 = vpop.f32.mrb[45].mxu0  ;;  %v2472_v20 = vld [vmem:[#allocation3 + $0x48] sm:$0xff] }
 0x361   : > { %1991 = vst.msk [vmem:[#allocation3 + $0x58] sm:$0xff] %vm1223_vm14, %v1975_v29  ;;  %v1936_v52 = vpop.f32.mrb[46].mxu0 }
 0x362   : > { %v1938_v63 = vpop.f32.mrb[47].mxu0 }
 0x364   : > { %v1458_v32 = vpop.f32.mrb[28].mxu1  ;;  %v1960_v1 = vld [vmem:[#allocation3 + $0x60] sm:$0xff] }
 0x365   : > { %1479 = vst.msk [vmem:[#allocation3 + $0x70] sm:$0xff] %vm1223_vm14, %v1458_v32  ;;  %v1976_v45 = vadd.f32 %v1960_v1, %v1933_v42  ;;  %v1460_v58 = vpop.f32.mrb[29].mxu1 }
 0x366   : > { %v1461_v36 = vpop.f32.mrb[30].mxu1  ;;  %v1961_v56 = vld [vmem:[#allocation3 + $0x68] sm:$0xff]  ;;  %v2473_v35 = vld [vmem:[#allocation3 + $0x50] sm:$0xff] }
 0x367   : > { %1992 = vst.msk [vmem:[#allocation3 + $0x60] sm:$0xff] %vm1223_vm14, %v1976_v45  ;;  %1480 = vst.msk [vmem:[#allocation3 + $0x78] sm:$0xff] %vm1223_vm14, %v1461_v36  ;;  %v1977_v8 = vadd.f32 %v1961_v56, %v1936_v52  ;;  %v1463_v17 = vpop.f32.mrb[31].mxu1  ;;  %v1941_v15 = vpop.f32.mrb[48].mxu0 }
 0x368   : > { %v1943_v49 = vpop.f32.mrb[49].mxu0  ;;  %v2474_v58 = vld [vmem:[#allocation3 + $0x58] sm:$0xff] }
 0x369   : > { %1993 = vst.msk [vmem:[#allocation3 + $0x68] sm:$0xff] %vm1223_vm14, %v1977_v8  ;;  %v1944_v48 = vpop.f32.mrb[50].mxu0 }
 0x36a   : > { %v1946_v53 = vpop.f32.mrb[51].mxu0 }
 0x36c   : > { %v1962_v54 = vld [vmem:[#allocation3 + $0x70] sm:$0xff]  ;;  %v2424_v0 = vpop.f32.mrb[32].mxu1 }
 0x36d   : > { %v1978_v55 = vadd.f32 %v1962_v54, %v1941_v15  ;;  %v2485_v51 = vadd.f32 %v2469_v16, %v2424_v0  ;;  %v2426_v2 = vpop.f32.mrb[33].mxu1  ;;  %v2467_v15 = vld [vmem:[#allocation3 + $0x20] sm:$0xff] }
 0x36e   : > { %v1963_v47 = vld [vmem:[#allocation3 + $0x78] sm:$0xff]  ;;  %v2427_v3 = vpop.f32.mrb[34].mxu1 }
 0x36f   : > { %1994 = vst.msk [vmem:[#allocation3 + $0x70] sm:$0xff] %vm1223_vm14, %v1978_v55  ;;  %2501 = vst.msk [vmem:[#allocation3 + $0x30] sm:$0xff] %vm1223_vm14, %v2485_v51  ;;  %v1979_v26 = vadd.f32 %v1963_v47, %v1944_v48  ;;  %v2486_v59 = vadd.f32 %v2470_v6, %v2427_v3  ;;  %v2429_v4 = vpop.f32.mrb[35].mxu1  ;;  %v2400_v39 = vpop.f32.mrb[52].mxu0  ;;  %v2468_v51 = vld [vmem:[#allocation3 + $0x28] sm:$0xff] }
 0x370   : > { %v2479_v5 = vadd.f32 %v2463_v18, %v2400_v39  ;;  %v2402_v24 = vpop.f32.mrb[53].mxu0  ;;  %v2475_v18 = vld [vmem:[#allocation3 + $0x60] sm:$0xff] }
 0x371   : > { %1995 = vst.msk [vmem:[#allocation3 + $0x78] sm:$0xff] %vm1223_vm14, %v1979_v26  ;;  %2502 = vst.msk [vmem:[#allocation3 + $0x38] sm:$0xff] %vm1223_vm14, %v2486_v59  ;;  %v2403_v9 = vpop.f32.mrb[54].mxu0 }
 0x372   : > { %2495 = vst.msk [vmem:[#allocation3] sm:$0xff] %vm1223_vm14, %v2479_v5  ;;  %v2480_v14 = vadd.f32 %v2464_v12, %v2403_v9  ;;  %v2405_v31 = vpop.f32.mrb[55].mxu0 }
 0x373   : > { %v2476_v31 = vld [vmem:[#allocation3 + $0x68] sm:$0xff] }
 0x374   : > { %2496 = vst.msk [vmem:[#allocation3 + $0x8] sm:$0xff] %vm1223_vm14, %v2480_v14  ;;  %v2432_v19 = vpop.f32.mrb[36].mxu1 }
 0x375   : > { %v2487_v46 = vadd.f32 %v2471_v30, %v2432_v19  ;;  %v2434_v60 = vpop.f32.mrb[37].mxu1 }
 0x376   : > { %v2517_v50 = vld [vmem:[#allocation3 + $0x30] sm:$0xff]  ;;  %v2435_v40 = vpop.f32.mrb[38].mxu1 }
 0x377   : > { %v2540_v41 = vadd.f32 %v4465_v37, %v2517_v50  ;;  %2503 = vst.msk [vmem:[#allocation3 + $0x40] sm:$0xff] %vm1223_vm14, %v2487_v46  ;;  %v2488_v33 = vadd.f32 %v2472_v20, %v2435_v40  ;;  %v2437_v44 = vpop.f32.mrb[39].mxu1  ;;  %v2408_v62 = vpop.f32.mrb[56].mxu0 }
 0x378   : > { %v2518_v7 = vld [vmem:[#allocation3 + $0x38] sm:$0xff]  ;;  %v2481_v38 = vadd.f32 %v2465_v34, %v2408_v62  ;;  %v2410_v57 = vpop.f32.mrb[57].mxu0 }
 0x379   : > { %v2556_v61 = vmax.f32 %v2540_v41, 0.0  ;;  %v2541_v13 = vadd.f32 %v4465_v37, %v2518_v7  ;;  %v2511_v27 = vld [vmem:[#allocation3] sm:$0xff]  ;;  %2504 = vst.msk [vmem:[#allocation3 + $0x48] sm:$0xff] %vm1223_vm14, %v2488_v33  ;;  %v2411_v11 = vpop.f32.mrb[58].mxu0 }
 0x37a   : > { %v2534_v10 = vadd.f32 %v4465_v37, %v2511_v27  ;;  %2497 = vst.msk [vmem:[#allocation3 + $0x10] sm:$0xff] %vm1223_vm14, %v2481_v38  ;;  %v2482_v43 = vadd.f32 %v2466_v21, %v2411_v11  ;;  %v2413_v23 = vpop.f32.mrb[59].mxu0  ;;  %v2477_v38 = vld [vmem:[#allocation3 + $0x70] sm:$0xff]  ;;  %v2478_v21 = vld [vmem:[#allocation3 + $0x78] sm:$0xff] }
 0x37b   : > { %2572 = vst.msk [vmem:[%s3982_s28 + $0x30] sm:$0xff] %vm1223_vm14, %v2556_v61  ;;  %v2557_v22 = vmax.f32 %v2541_v13, 0.0  ;;  %v2512_v28 = vld [vmem:[#allocation3 + $0x8] sm:$0xff] }
 0x37c   : > { %v2550_v29 = vmax.f32 %v2534_v10, 0.0  ;;  %v2535_v25 = vadd.f32 %v4465_v37, %v2512_v28  ;;  %2498 = vst.msk [vmem:[#allocation3 + $0x18] sm:$0xff] %vm1223_vm14, %v2482_v43  ;;  %v2440_v42 = vpop.f32.mrb[40].mxu1 }
 0x37d   : > { %2573 = vst.msk [vmem:[%s3982_s28 + $0x38] sm:$0xff] %vm1223_vm14, %v2557_v22  ;;  %v2489_v52 = vadd.f32 %v2473_v35, %v2440_v42  ;;  %v2442_v63 = vpop.f32.mrb[41].mxu1 }
 0x37e   : > { %2566 = vst.msk [vmem:[%s3982_s28] sm:$0xff] %vm1223_vm14, %v2550_v29  ;;  %v2551_v32 = vmax.f32 %v2535_v25, 0.0  ;;  %v2519_v1 = vld [vmem:[#allocation3 + $0x40] sm:$0xff]  ;;  %v2443_v45 = vpop.f32.mrb[42].mxu1 }
 0x37f   : > { %v2542_v36 = vadd.f32 %v4465_v37, %v2519_v1  ;;  %2505 = vst.msk [vmem:[#allocation3 + $0x50] sm:$0xff] %vm1223_vm14, %v2489_v52  ;;  %v2490_v56 = vadd.f32 %v2474_v58, %v2443_v45  ;;  %v2445_v8 = vpop.f32.mrb[43].mxu1  ;;  %v2416_v17 = vpop.f32.mrb[60].mxu0 }
 0x380   : > { %2567 = vst.msk [vmem:[%s3982_s28 + $0x8] sm:$0xff] %vm1223_vm14, %v2551_v32  ;;  %v2520_v49 = vld [vmem:[#allocation3 + $0x48] sm:$0xff]  ;;  %v2483_v48 = vadd.f32 %v2467_v15, %v2416_v17  ;;  %v2418_v53 = vpop.f32.mrb[61].mxu0 }
 0x381   : > { %v2558_v54 = vmax.f32 %v2542_v36, 0.0  ;;  %v2543_v0 = vadd.f32 %v4465_v37, %v2520_v49  ;;  %v2513_v16 = vld [vmem:[#allocation3 + $0x10] sm:$0xff]  ;;  %2506 = vst.msk [vmem:[#allocation3 + $0x58] sm:$0xff] %vm1223_vm14, %v2490_v56  ;;  %v2419_v55 = vpop.f32.mrb[62].mxu0 }
 0x382   : > { %v2536_v2 = vadd.f32 %v4465_v37, %v2513_v16  ;;  %2499 = vst.msk [vmem:[#allocation3 + $0x20] sm:$0xff] %vm1223_vm14, %v2483_v48  ;;  %v2484_v47 = vadd.f32 %v2468_v51, %v2419_v55  ;;  %v2421_v3 = vpop.f32.mrb[63].mxu0 }
 0x383   : > { %2574 = vst.msk [vmem:[%s3982_s28 + $0x40] sm:$0xff] %vm1223_vm14, %v2558_v54  ;;  %v2559_v6 = vmax.f32 %v2543_v0, 0.0  ;;  %v2514_v26 = vld [vmem:[#allocation3 + $0x18] sm:$0xff] }
 0x384   : > { %v2552_v59 = vmax.f32 %v2536_v2, 0.0  ;;  %v2537_v4 = vadd.f32 %v4465_v37, %v2514_v26  ;;  %2500 = vst.msk [vmem:[#allocation3 + $0x28] sm:$0xff] %vm1223_vm14, %v2484_v47  ;;  %v2448_v39 = vpop.f32.mrb[44].mxu1 }
 0x385   : > { %2575 = vst.msk [vmem:[%s3982_s28 + $0x48] sm:$0xff] %vm1223_vm14, %v2559_v6  ;;  %v2491_v5 = vadd.f32 %v2475_v18, %v2448_v39  ;;  %v2450_v24 = vpop.f32.mrb[45].mxu1 }
 0x386   : > { %2568 = vst.msk [vmem:[%s3982_s28 + $0x10] sm:$0xff] %vm1223_vm14, %v2552_v59  ;;  %v2553_v9 = vmax.f32 %v2537_v4, 0.0  ;;  %v2521_v12 = vld [vmem:[#allocation3 + $0x50] sm:$0xff]  ;;  %v2451_v14 = vpop.f32.mrb[46].mxu1 }
 0x387   : > { %v2544_v19 = vadd.f32 %v4465_v37, %v2521_v12  ;;  %2507 = vst.msk [vmem:[#allocation3 + $0x60] sm:$0xff] %vm1223_vm14, %v2491_v5  ;;  %v2492_v30 = vadd.f32 %v2476_v31, %v2451_v14  ;;  %v2453_v46 = vpop.f32.mrb[47].mxu1 }
 0x388   : > { %2569 = vst.msk [vmem:[%s3982_s28 + $0x18] sm:$0xff] %vm1223_vm14, %v2553_v9  ;;  %v2522_v60 = vld [vmem:[#allocation3 + $0x58] sm:$0xff] }
 0x389   : > { %v2560_v50 = vmax.f32 %v2544_v19, 0.0  ;;  %v2545_v40 = vadd.f32 %v4465_v37, %v2522_v60  ;;  %v2515_v20 = vld [vmem:[#allocation3 + $0x20] sm:$0xff]  ;;  %2508 = vst.msk [vmem:[#allocation3 + $0x68] sm:$0xff] %vm1223_vm14, %v2492_v30 }
 0x38a   : > { %v2538_v41 = vadd.f32 %v4465_v37, %v2515_v20 }
 0x38b   : > { %2576 = vst.msk [vmem:[%s3982_s28 + $0x50] sm:$0xff] %vm1223_vm14, %v2560_v50  ;;  %v2561_v33 = vmax.f32 %v2545_v40, 0.0  ;;  %v2516_v44 = vld [vmem:[#allocation3 + $0x28] sm:$0xff] }
 0x38c   : > { %v2554_v62 = vmax.f32 %v2538_v41, 0.0  ;;  %v2539_v34 = vadd.f32 %v4465_v37, %v2516_v44  ;;  %v2456_v7 = vpop.f32.mrb[48].mxu1 }
 0x38d   : > { %2577 = vst.msk [vmem:[%s3982_s28 + $0x58] sm:$0xff] %vm1223_vm14, %v2561_v33  ;;  %v2493_v57 = vadd.f32 %v2477_v38, %v2456_v7  ;;  %v2458_v61 = vpop.f32.mrb[49].mxu1 }
 0x38e   : > { %2570 = vst.msk [vmem:[%s3982_s28 + $0x20] sm:$0xff] %vm1223_vm14, %v2554_v62  ;;  %v2555_v13 = vmax.f32 %v2539_v34, 0.0  ;;  %v2523_v27 = vld [vmem:[#allocation3 + $0x60] sm:$0xff]  ;;  %v2459_v11 = vpop.f32.mrb[50].mxu1 }
 0x38f   : > { %v2546_v10 = vadd.f32 %v4465_v37, %v2523_v27  ;;  %2509 = vst.msk [vmem:[#allocation3 + $0x70] sm:$0xff] %vm1223_vm14, %v2493_v57  ;;  %v2494_v43 = vadd.f32 %v2478_v21, %v2459_v11  ;;  %v2461_v23 = vpop.f32.mrb[51].mxu1 }
 0x390   : > { %2571 = vst.msk [vmem:[%s3982_s28 + $0x28] sm:$0xff] %vm1223_vm14, %v2555_v13  ;;  %v2524_v22 = vld [vmem:[#allocation3 + $0x68] sm:$0xff] }
 0x391   : > { %v2562_v28 = vmax.f32 %v2546_v10, 0.0  ;;  %v2547_v29 = vadd.f32 %v4465_v37, %v2524_v22  ;;  %2510 = vst.msk [vmem:[#allocation3 + $0x78] sm:$0xff] %vm1223_vm14, %v2494_v43 }
 0x393   : > { %2578 = vst.msk [vmem:[%s3982_s28 + $0x60] sm:$0xff] %vm1223_vm14, %v2562_v28  ;;  %v2563_v25 = vmax.f32 %v2547_v29, 0.0 }
 0x395   : > { %2579 = vst.msk [vmem:[%s3982_s28 + $0x68] sm:$0xff] %vm1223_vm14, %v2563_v25 }
 0x396   : > { %v2525_v42 = vld [vmem:[#allocation3 + $0x70] sm:$0xff] }
 0x397   : > { %v2548_v35 = vadd.f32 %v4465_v37, %v2525_v42 }
 0x398   : > { %v2526_v52 = vld [vmem:[#allocation3 + $0x78] sm:$0xff] }
 0x399   : > { %v2564_v63 = vmax.f32 %v2548_v35, 0.0  ;;  %v2549_v32 = vadd.f32 %v4465_v37, %v2526_v52 }
 0x39b   : > { %2580 = vst.msk [vmem:[%s3982_s28 + $0x70] sm:$0xff] %vm1223_vm14, %v2564_v63  ;;  %v2565_v1 = vmax.f32 %v2549_v32, 0.0 }
 0x39d   : > { %2581 = vst.msk [vmem:[%s3982_s28 + $0x78] sm:$0xff] %vm1223_vm14, %v2565_v1 }
 0x39e   : > { %3377 = shalt.err (!%p3374_p6)
}
 0x39f   : > { %s3378_s2 = scalar_lea.hbm %s4530_s12, 2048  ;;  %s3382_s30 = scalar_lea.hbm %s4640_s9, 8192 }
 0x3a0   : > { %p3379_p2 = scmp.ne.s32.totalorder %s4530_s12, %s3378_s2  ;;  %p3383_p9 = scmp.lt.u32.totalorder %s4530_s12, %s4640_s9 }
 0x3a1   : > { %p3384_p8 = scmp.lt.u32.totalorder %s3382_s30, %s3378_s2  ;;  %p3386_p0 = scmp.lt.u32.totalorder %s3378_s2, %s4530_s12 }
 0x3a2   : > { %p3380_p13 = pnand %p3379_p2, %p3711_p3 }
 0x3a3   : > { %p3385_p10 = por %p3384_p8, %p3383_p9 }
 0x3a4   : > { %p3381_p4 = pneg %p3380_p13 }
 0x3a5   : > { %p3387_p5 = por %p3386_p0, %p3385_p10 }
 0x3a7   : > { %p3388_p7 = pnand %p3387_p5, %p3381_p4 }
 0x3a9   : > { %3391 = shalt.err (!%p3388_p7)
}
 0x3aa   : > { %s3485_s27 = smov 128   ;;  %s3486_s11 = smov 8  }
 0x3ab   : > { %3006 = dma.vmem_to_hbm [thread:$0]  (%p3711_p3), %s4532_s3, 2048, %s4530_s12, %s2583_s14, %s3485_s27, %s3485_s27, %s3486_s11  }
 0x3ac PF: > { %s4641_s1 = sld [smem:[#allocation18_spill]]  ;;  %s4642_s21 = sld [smem:[#allocation20_spill]] }
 0x3ad   : > { %p3038_p11 = scmp.ge.s32.totalorder %s3470_s25, 2 }
 0x3b2   : > { %s2614_s13 = sand.u32 1, %s4641_s1   ;;  %p4643_p1 = scmp.ne.s32.totalorder %s4642_s21, 0 }
 0x3b3   : > { %s2615_s5 = scalar_lea.sflag [#allocation6], %s2614_s13 }
 0x3b4   : > { %p3026_p12 = pnand %p3038_p11, %p4643_p1 }
 0x3b6   : > { %3437 = dma.done.wait (!%p3026_p12), %s2615_s5, 2048  }
 0x3b7   : > { %3439 = vsyncadd (!%p3026_p12), %s2615_s5, 4294965248  ;;  %s23_s25 = sadd.s32 1, %s3470_s25   ;;  %s4644_s18 = smov %s3446_s19 }
 0x3b8   : > { %p20_p6 = scmp.ge.s32.totalorder %s23_s25, 6   ;;  %s4645_s19 = smov %s3450_s20 }
 0x3b9   : > { %s4646_s20 = smov %s3730_s16  ;;  %s4647_s21 = smov %s3462_s23 }
 0x3ba   : > { %s4648_s22 = smov %s3466_s24  ;;  %s4649_s23 = smov %s4652_s8 }
 0x3bb   : > { %s4650_s24 = smov %s4656_s26  ;;  %22 = sbr.rel (!%p20_p6) target bundleno = 14 (0xe), region = 114 }
 0x3c2   :  { %2620 = vsyncpa [#allocation5], 1 }
 0x3c3   :  { %2622 = vsyncpa [#allocation5 + $0x1], 1 }
 0x3c4   :  { %2623 = vsyncpa [#allocation8], 1 }
 0x3c5   :  { %2624 = vsyncpa [#allocation11], 1 }
 0x3c6   :  { %2625 = vsyncpa [#allocation6], 1 }
 0x3c7   :  { %2627 = vsyncpa [#allocation6 + $0x1], 1 }

</bundles_post_ra>
